<compile_context>
chip_gen: v6e
topology: v6e:2x2x1
jax: 0.10.0
libtpu: 0.0.40
codegen_flags: <defaults>
</compile_context>

<pallas_src>
import functools

import jax
import jax.numpy as jnp
from jax import lax
from jax.experimental import pallas as pl
from jax.experimental.pallas import tpu as pltpu

# ---------------- model config (small, OPT-like) ----------------
VOCAB = 100
D_MODEL = 64          # hidden size
N_HEADS = 4
HEAD_DIM = D_MODEL // N_HEADS
D_FFN = 128
N_LAYERS = 2
LN_EPS = 1e-5
NEG = -1e9            # additive-mask sentinel (f32); use ~-3e4 if mask ever goes bf16


def _layer_norm(x, w, b, eps=LN_EPS):
    mu = jnp.mean(x, axis=-1, keepdims=True)
    var = jnp.mean((x - mu) ** 2, axis=-1, keepdims=True)
    return (x - mu) * lax.rsqrt(var + eps) * w + b


def _build_attn_bias(pad_row, batch, seq):
    """Additive bias (BS, BS) over the flattened batch*seq axis.

    Allowed iff (same batch) AND (causal) AND (key not padded). Cross-batch entries get an
    extra -1e9 so that even a fully-padded row softmaxes uniformly over its OWN batch's keys
    (matching per-batch semantics of the reference).  pad_row: (1, B*S) float32 of {0,1}.
    """
    bs = batch * seq
    r = lax.broadcasted_iota(jnp.int32, (bs, bs), 0)
    c = lax.broadcasted_iota(jnp.int32, (bs, bs), 1)
    if (seq & (seq - 1)) == 0:          # power-of-two seq: shifts/ands only
        sh = seq.bit_length() - 1
        rb, cb = r >> sh, c >> sh
        rp, cp = r & (seq - 1), c & (seq - 1)
    else:
        rb, cb = r // seq, c // seq
        rp, cp = r % seq, c % seq
    same_batch = rb == cb
    causal = cp <= rp
    key_ok = pad_row > 0.0              # (1, BS) broadcasts over rows
    bias = jnp.where(same_batch & causal & key_ok, 0.0, NEG)
    bias = bias + jnp.where(same_batch, 0.0, NEG)   # cross-batch strictly more masked
    return bias                                      # (BS, BS) float32


# ---------------- fully fused OPT forward kernel ----------------
def opt_forward_kernel(emb_ref, pad_ref,
                       ln1w_ref, ln1b_ref, wqkv_ref, bqkv_ref, wo_ref, bo_ref,
                       ln2w_ref, ln2b_ref, w1_ref, b1_ref, w2_ref, b2_ref,
                       flnw_ref, flnb_ref, out_ref, *, num_heads, num_layers):
    B, S, D = emb_ref.shape
    BS = B * S
    H = num_heads
    Dh = D // H
    scale = 1.0 / (Dh ** 0.5)
    wdt = wqkv_ref.dtype                                  # matmul weight dtype (bf16)

    # Flatten batch into the matmul M dimension; keep activations in f32.
    h = emb_ref[...].astype(jnp.float32).reshape(BS, D)

    # Attention bias built once, reused by every layer (hoisted out of the layer loop).
    bias = _build_attn_bias(pad_ref[...].astype(jnp.float32), B, S)   # (BS, BS)

    for li in range(num_layers):                          # static unrolled loop (2 layers)
        # ---------- self-attention block (pre-LN, OPT do_layer_norm_before=True) ----------
        residual = h
        x = _layer_norm(h, ln1w_ref[li], ln1b_ref[li])

        qkv = jnp.dot(x.astype(wdt), wqkv_ref[li],
                      preferred_element_type=jnp.float32) + bqkv_ref[li]      # (BS, 3D)
        q = qkv[:, 0 * D:1 * D] * scale                   # OPT scales queries
        k = qkv[:, 1 * D:2 * D]
        v = qkv[:, 2 * D:3 * D]

        # Heads as a leading batch axis -> one batched contraction instead of a head loop.
        qs = jnp.stack([q[:, i * Dh:(i + 1) * Dh] for i in range(H)], axis=0)  # (H,BS,Dh)
        ks = jnp.stack([k[:, i * Dh:(i + 1) * Dh] for i in range(H)], axis=0)
        vs = jnp.stack([v[:, i * Dh:(i + 1) * Dh] for i in range(H)], axis=0)

        s = jnp.einsum('hqd,hkd->hqk', qs, ks,
                       preferred_element_type=jnp.float32)                    # (H,BS,BS)
        s = s + bias[None]
        s = s - jnp.max(s, axis=-1, keepdims=True)
        p = jnp.exp(s)
        p = p * pl.reciprocal(jnp.sum(p, axis=-1, keepdims=True), approx=True)
        ctx = jnp.einsum('hqk,hkd->hqd', p, vs,
                         preferred_element_type=jnp.float32)                  # (H,BS,Dh)

        merged = jnp.concatenate([ctx[i] for i in range(H)], axis=-1)         # (BS, D)
        attn = jnp.dot(merged.astype(wdt), wo_ref[li],
                       preferred_element_type=jnp.float32) + bo_ref[li]
        h = residual + attn

        # ---------------------------- MLP block (pre-LN) ----------------------------
        residual = h
        y = _layer_norm(h, ln2w_ref[li], ln2b_ref[li])
        y = jnp.dot(y.astype(wdt), w1_ref[li],
                    preferred_element_type=jnp.float32) + b1_ref[li]
        y = jnp.maximum(y, 0.0)                           # ReLU (OPT activation="relu")
        y = jnp.dot(y.astype(wdt), w2_ref[li],
                    preferred_element_type=jnp.float32) + b2_ref[li]
        h = residual + y

    # ---------------------------- final layer norm ----------------------------
    out = _layer_norm(h, flnw_ref[...], flnb_ref[...])
    out_ref[...] = out.reshape(B, S, D).astype(out_ref.dtype)


# ---------------- parameter init (deterministic, synthetic; per-layer params stacked) ----------------
def init_params(key):
    def nrm(k, shape, std=0.02):
        return std * jax.random.normal(k, shape, dtype=jnp.float32)

    keys = jax.random.split(key, 1 + N_LAYERS)
    wqkv, wo, w1, w2 = [], [], [], []
    for li in range(N_LAYERS):
        ks = jax.random.split(keys[1 + li], 6)
        wq = nrm(ks[0], (D_MODEL, D_MODEL))
        wk = nrm(ks[1], (D_MODEL, D_MODEL))
        wv = nrm(ks[2], (D_MODEL, D_MODEL))
        wqkv.append(jnp.concatenate([wq, wk, wv], axis=1))   # fused (D, 3D)
        wo.append(nrm(ks[3], (D_MODEL, D_MODEL)))
        w1.append(nrm(ks[4], (D_MODEL, D_FFN)))
        w2.append(nrm(ks[5], (D_FFN, D_MODEL)))

    L = N_LAYERS
    wdt = jnp.bfloat16   # matmul weights stored bf16; kernel accumulates in f32
    return {
        "embed": nrm(keys[0], (VOCAB, D_MODEL)),
        "ln1_w": jnp.ones((L, 1, D_MODEL), jnp.float32),
        "ln1_b": jnp.zeros((L, 1, D_MODEL), jnp.float32),
        "wqkv": jnp.stack(wqkv).astype(wdt),
        "bqkv": jnp.zeros((L, 1, 3 * D_MODEL), jnp.float32),
        "wo": jnp.stack(wo).astype(wdt),
        "bo": jnp.zeros((L, 1, D_MODEL), jnp.float32),
        "ln2_w": jnp.ones((L, 1, D_MODEL), jnp.float32),
        "ln2_b": jnp.zeros((L, 1, D_MODEL), jnp.float32),
        "w1": jnp.stack(w1).astype(wdt),
        "b1": jnp.zeros((L, 1, D_FFN), jnp.float32),
        "w2": jnp.stack(w2).astype(wdt),
        "b2": jnp.zeros((L, 1, D_MODEL), jnp.float32),
        "final_ln_w": jnp.ones((1, D_MODEL), jnp.float32),
        "final_ln_b": jnp.zeros((1, D_MODEL), jnp.float32),
    }


# ---------------- OPTNode1 forward ----------------
def opt_node1_forward(input_ids, attention_mask, params):
    """input_ids: (B,S) int32; attention_mask: (B,S) {0,1} padding mask."""
    B, S = input_ids.shape
    # TODO(synk): embedding gather (token-id row lookup) stays in plain JAX; data-dependent
    # gather has no clean BlockSpec equivalent and is negligible at this size.
    h = jnp.take(params["embed"], input_ids, axis=0)              # (B, S, D)
    pad_row = attention_mask.reshape(1, B * S).astype(jnp.float32)  # key-padding row

    kernel = functools.partial(opt_forward_kernel,
                               num_heads=N_HEADS, num_layers=N_LAYERS)
    vmem = functools.partial(pl.BlockSpec, memory_space=pltpu.MemorySpace.VMEM)
    args = (h, pad_row,
            params["ln1_w"], params["ln1_b"], params["wqkv"], params["bqkv"],
            params["wo"], params["bo"], params["ln2_w"], params["ln2_b"],
            params["w1"], params["b1"], params["w2"], params["b2"],
            params["final_ln_w"], params["final_ln_b"])

    # Single fused invocation (no grid): weights DMA'd once, activations VMEM-resident.
    # NOTE(v7x): with larger B one could add a leading "parallel" batch grid axis to use
    # both TensorCores; at B=2, S=8 the single fused step is faster on all generations.
    return pl.pallas_call(
        kernel,
        out_shape=jax.ShapeDtypeStruct((B, S, D_MODEL), jnp.float32),
        in_specs=[vmem() for _ in args],
        out_specs=vmem(),
    )(*args)


if __name__ == "__main__":
    key = jax.random.PRNGKey(0)
    pkey, ikey = jax.random.split(key)

    B, S = 2, 8
    params = init_params(pkey)
    input_ids = jax.random.randint(ikey, (B, S), 0, VOCAB, dtype=jnp.int32)
    attention_mask = jnp.ones((B, S), dtype=jnp.int32)  # no padding

    out = opt_node1_forward(input_ids, attention_mask, params)
    out = jax.block_until_ready(out)
    assert out.shape == (B, S, D_MODEL)
    assert jnp.all(jnp.isfinite(out))
    print("KERNEL_OK")
</pallas_src>

<mosaic_0001>
module attributes {stable_mosaic.version = 11 : i64} {
  func.func @opt_forward_kernel(%arg0: memref<2x8x64xf32, #tpu.memory_space<vmem>>, %arg1: memref<1x16xf32, #tpu.memory_space<vmem>>, %arg2: memref<2x1x64xf32, #tpu.memory_space<vmem>>, %arg3: memref<2x1x64xf32, #tpu.memory_space<vmem>>, %arg4: memref<2x64x192xbf16, #tpu.memory_space<vmem>>, %arg5: memref<2x1x192xf32, #tpu.memory_space<vmem>>, %arg6: memref<2x64x64xbf16, #tpu.memory_space<vmem>>, %arg7: memref<2x1x64xf32, #tpu.memory_space<vmem>>, %arg8: memref<2x1x64xf32, #tpu.memory_space<vmem>>, %arg9: memref<2x1x64xf32, #tpu.memory_space<vmem>>, %arg10: memref<2x64x128xbf16, #tpu.memory_space<vmem>>, %arg11: memref<2x1x128xf32, #tpu.memory_space<vmem>>, %arg12: memref<2x128x64xbf16, #tpu.memory_space<vmem>>, %arg13: memref<2x1x64xf32, #tpu.memory_space<vmem>>, %arg14: memref<1x64xf32, #tpu.memory_space<vmem>>, %arg15: memref<1x64xf32, #tpu.memory_space<vmem>>, %arg16: memref<2x8x64xf32, #tpu.memory_space<vmem>>) attributes {dimension_semantics = [], scalar_prefetch = 0 : i64, scratch_operands = 0 : i64, tpu.core_type = #tpu.core_type<tc>} {
    %c0 = arith.constant 0 : index
    %c0_0 = arith.constant 0 : index
    %c0_1 = arith.constant 0 : index
    %0 = vector.load %arg0[%c0, %c0_0, %c0_1] : memref<2x8x64xf32, #tpu.memory_space<vmem>>, vector<2x8x64xf32>
    %1 = vector.shape_cast %0 : vector<2x8x64xf32> to vector<16x64xf32>
    %c0_2 = arith.constant 0 : index
    %c0_3 = arith.constant 0 : index
    %2 = vector.load %arg1[%c0_2, %c0_3] : memref<1x16xf32, #tpu.memory_space<vmem>>, vector<1x16xf32>
    %3 = tpu.iota {dimensions = array<i32: 0>} : vector<16x16xi32>
    %4 = tpu.iota {dimensions = array<i32: 1>} : vector<16x16xi32>
    %c3_i32 = arith.constant 3 : i32
    %5 = vector.broadcast %c3_i32 : i32 to vector<16x16xi32>
    %6 = arith.shrsi %3, %5 : vector<16x16xi32>
    %c3_i32_4 = arith.constant 3 : i32
    %7 = vector.broadcast %c3_i32_4 : i32 to vector<16x16xi32>
    %8 = arith.shrsi %4, %7 : vector<16x16xi32>
    %c7_i32 = arith.constant 7 : i32
    %9 = vector.broadcast %c7_i32 : i32 to vector<16x16xi32>
    %10 = arith.andi %3, %9 : vector<16x16xi32>
    %c7_i32_5 = arith.constant 7 : i32
    %11 = vector.broadcast %c7_i32_5 : i32 to vector<16x16xi32>
    %12 = arith.andi %4, %11 : vector<16x16xi32>
    %13 = arith.cmpi eq, %6, %8 : vector<16x16xi32>
    %14 = arith.cmpi sle, %12, %10 : vector<16x16xi32>
    %cst = arith.constant 0.000000e+00 : f32
    %15 = vector.broadcast %cst : f32 to vector<1x16xf32>
    %16 = arith.cmpf ogt, %2, %15 : vector<1x16xf32>
    %17 = arith.andi %13, %14 : vector<16x16xi1>
    %18 = vector.broadcast %16 : vector<1x16xi1> to vector<16x16xi1>
    %19 = arith.andi %17, %18 : vector<16x16xi1>
    %cst_6 = arith.constant 0.000000e+00 : f32
    %cst_7 = arith.constant -1.000000e+09 : f32
    %20 = vector.broadcast %cst_6 : f32 to vector<16x16xf32>
    %21 = vector.broadcast %cst_7 : f32 to vector<16x16xf32>
    %22 = arith.select %19, %20, %21 : vector<16x16xi1>, vector<16x16xf32>
    %cst_8 = arith.constant 0.000000e+00 : f32
    %cst_9 = arith.constant -1.000000e+09 : f32
    %23 = vector.broadcast %cst_8 : f32 to vector<16x16xf32>
    %24 = vector.broadcast %cst_9 : f32 to vector<16x16xf32>
    %25 = arith.select %13, %23, %24 : vector<16x16xi1>, vector<16x16xf32>
    %26 = arith.addf %22, %25 : vector<16x16xf32>
    %c0_10 = arith.constant 0 : index
    %c0_11 = arith.constant 0 : index
    %c0_12 = arith.constant 0 : index
    %27 = vector.load %arg2[%c0_10, %c0_11, %c0_12] : memref<2x1x64xf32, #tpu.memory_space<vmem>>, vector<1x1x64xf32>
    %28 = vector.shape_cast %27 : vector<1x1x64xf32> to vector<1x64xf32>
    %c0_13 = arith.constant 0 : index
    %c0_14 = arith.constant 0 : index
    %c0_15 = arith.constant 0 : index
    %29 = vector.load %arg3[%c0_13, %c0_14, %c0_15] : memref<2x1x64xf32, #tpu.memory_space<vmem>>, vector<1x1x64xf32>
    %30 = vector.shape_cast %29 : vector<1x1x64xf32> to vector<1x64xf32>
    %cst_16 = arith.constant dense<0.000000e+00> : vector<16xf32>
    %31 = vector.multi_reduction <add>, %1, %cst_16 [1] : vector<16x64xf32> to vector<16xf32>
    %32 = vector.shape_cast %31 : vector<16xf32> to vector<16x1xf32>
    %cst_17 = arith.constant 6.400000e+01 : f32
    %33 = vector.broadcast %cst_17 : f32 to vector<16x1xf32>
    %34 = arith.divf %32, %33 : vector<16x1xf32>
    %35 = vector.broadcast %34 : vector<16x1xf32> to vector<16x64xf32>
    %36 = arith.subf %1, %35 : vector<16x64xf32>
    %37 = arith.mulf %36, %36 : vector<16x64xf32>
    %cst_18 = arith.constant dense<0.000000e+00> : vector<16xf32>
    %38 = vector.multi_reduction <add>, %37, %cst_18 [1] : vector<16x64xf32> to vector<16xf32>
    %39 = vector.shape_cast %38 : vector<16xf32> to vector<16x1xf32>
    %cst_19 = arith.constant 6.400000e+01 : f32
    %40 = vector.broadcast %cst_19 : f32 to vector<16x1xf32>
    %41 = arith.divf %39, %40 : vector<16x1xf32>
    %42 = vector.broadcast %34 : vector<16x1xf32> to vector<16x64xf32>
    %43 = arith.subf %1, %42 : vector<16x64xf32>
    %cst_20 = arith.constant 9.99999974E-6 : f32
    %44 = vector.broadcast %cst_20 : f32 to vector<16x1xf32>
    %45 = arith.addf %41, %44 : vector<16x1xf32>
    %46 = math.rsqrt %45 : vector<16x1xf32>
    %47 = vector.broadcast %46 : vector<16x1xf32> to vector<16x64xf32>
    %48 = arith.mulf %43, %47 : vector<16x64xf32>
    %49 = vector.broadcast %28 : vector<1x64xf32> to vector<16x64xf32>
    %50 = arith.mulf %48, %49 : vector<16x64xf32>
    %51 = vector.broadcast %30 : vector<1x64xf32> to vector<16x64xf32>
    %52 = arith.addf %50, %51 : vector<16x64xf32>
    %53 = arith.truncf %52 : vector<16x64xf32> to vector<16x64xbf16>
    %c0_21 = arith.constant 0 : index
    %c0_22 = arith.constant 0 : index
    %c0_23 = arith.constant 0 : index
    %54 = vector.load %arg4[%c0_21, %c0_22, %c0_23] : memref<2x64x192xbf16, #tpu.memory_space<vmem>>, vector<1x64x192xbf16>
    %55 = vector.shape_cast %54 : vector<1x64x192xbf16> to vector<64x192xbf16>
    %cst_24 = arith.constant dense<0.000000e+00> : vector<16x192xf32>
    %56 = tpu.matmul %53, %55, %cst_24 {dimension_numbers = #tpu.dot_dimension_numbers<[1], [0], [0], [1], [0, 0, 1, 1], [], []>} : vector<16x64xbf16>, vector<64x192xbf16>, vector<16x192xf32> -> vector<16x192xf32>
    %c0_25 = arith.constant 0 : index
    %c0_26 = arith.constant 0 : index
    %c0_27 = arith.constant 0 : index
    %57 = vector.load %arg5[%c0_25, %c0_26, %c0_27] : memref<2x1x192xf32, #tpu.memory_space<vmem>>, vector<1x1x192xf32>
    %58 = vector.shape_cast %57 : vector<1x1x192xf32> to vector<1x192xf32>
    %59 = vector.broadcast %58 : vector<1x192xf32> to vector<16x192xf32>
    %60 = arith.addf %56, %59 : vector<16x192xf32>
    %61 = vector.extract_strided_slice %60 {offsets = [0, 0], sizes = [16, 64], strides = [1, 1]} : vector<16x192xf32> to vector<16x64xf32>
    %cst_28 = arith.constant 2.500000e-01 : f32
    %62 = vector.broadcast %cst_28 : f32 to vector<16x64xf32>
    %63 = arith.mulf %61, %62 : vector<16x64xf32>
    %64 = vector.extract_strided_slice %60 {offsets = [0, 64], sizes = [16, 64], strides = [1, 1]} : vector<16x192xf32> to vector<16x64xf32>
    %65 = vector.extract_strided_slice %60 {offsets = [0, 128], sizes = [16, 64], strides = [1, 1]} : vector<16x192xf32> to vector<16x64xf32>
    %66 = vector.extract_strided_slice %63 {offsets = [0, 0], sizes = [16, 16], strides = [1, 1]} : vector<16x64xf32> to vector<16x16xf32>
    %67 = vector.extract_strided_slice %63 {offsets = [0, 16], sizes = [16, 16], strides = [1, 1]} : vector<16x64xf32> to vector<16x16xf32>
    %68 = vector.extract_strided_slice %63 {offsets = [0, 32], sizes = [16, 16], strides = [1, 1]} : vector<16x64xf32> to vector<16x16xf32>
    %69 = vector.extract_strided_slice %63 {offsets = [0, 48], sizes = [16, 16], strides = [1, 1]} : vector<16x64xf32> to vector<16x16xf32>
    %70 = vector.shape_cast %66 : vector<16x16xf32> to vector<1x16x16xf32>
    %71 = vector.shape_cast %67 : vector<16x16xf32> to vector<1x16x16xf32>
    %72 = vector.shape_cast %68 : vector<16x16xf32> to vector<1x16x16xf32>
    %73 = vector.shape_cast %69 : vector<16x16xf32> to vector<1x16x16xf32>
    %74 = tpu.concatenate %70, %71, %72, %73 in 0 : vector<1x16x16xf32>, vector<1x16x16xf32>, vector<1x16x16xf32>, vector<1x16x16xf32> -> vector<4x16x16xf32>
    %75 = vector.extract_strided_slice %64 {offsets = [0, 0], sizes = [16, 16], strides = [1, 1]} : vector<16x64xf32> to vector<16x16xf32>
    %76 = vector.extract_strided_slice %64 {offsets = [0, 16], sizes = [16, 16], strides = [1, 1]} : vector<16x64xf32> to vector<16x16xf32>
    %77 = vector.extract_strided_slice %64 {offsets = [0, 32], sizes = [16, 16], strides = [1, 1]} : vector<16x64xf32> to vector<16x16xf32>
    %78 = vector.extract_strided_slice %64 {offsets = [0, 48], sizes = [16, 16], strides = [1, 1]} : vector<16x64xf32> to vector<16x16xf32>
    %79 = vector.shape_cast %75 : vector<16x16xf32> to vector<1x16x16xf32>
    %80 = vector.shape_cast %76 : vector<16x16xf32> to vector<1x16x16xf32>
    %81 = vector.shape_cast %77 : vector<16x16xf32> to vector<1x16x16xf32>
    %82 = vector.shape_cast %78 : vector<16x16xf32> to vector<1x16x16xf32>
    %83 = tpu.concatenate %79, %80, %81, %82 in 0 : vector<1x16x16xf32>, vector<1x16x16xf32>, vector<1x16x16xf32>, vector<1x16x16xf32> -> vector<4x16x16xf32>
    %84 = vector.extract_strided_slice %65 {offsets = [0, 0], sizes = [16, 16], strides = [1, 1]} : vector<16x64xf32> to vector<16x16xf32>
    %85 = vector.extract_strided_slice %65 {offsets = [0, 16], sizes = [16, 16], strides = [1, 1]} : vector<16x64xf32> to vector<16x16xf32>
    %86 = vector.extract_strided_slice %65 {offsets = [0, 32], sizes = [16, 16], strides = [1, 1]} : vector<16x64xf32> to vector<16x16xf32>
    %87 = vector.extract_strided_slice %65 {offsets = [0, 48], sizes = [16, 16], strides = [1, 1]} : vector<16x64xf32> to vector<16x16xf32>
    %88 = vector.shape_cast %84 : vector<16x16xf32> to vector<1x16x16xf32>
    %89 = vector.shape_cast %85 : vector<16x16xf32> to vector<1x16x16xf32>
    %90 = vector.shape_cast %86 : vector<16x16xf32> to vector<1x16x16xf32>
    %91 = vector.shape_cast %87 : vector<16x16xf32> to vector<1x16x16xf32>
    %92 = tpu.concatenate %88, %89, %90, %91 in 0 : vector<1x16x16xf32>, vector<1x16x16xf32>, vector<1x16x16xf32>, vector<1x16x16xf32> -> vector<4x16x16xf32>
    "tpu.trace_start"() <{level = 10 : i32, message = "hqd,hkd->hqk"}> : () -> ()
    %cst_29 = arith.constant dense<0.000000e+00> : vector<4x16x16xf32>
    %93 = tpu.matmul %74, %83, %cst_29 {dimension_numbers = #tpu.dot_dimension_numbers<[2], [2], [1], [1], [0, 0, 0, 1, 1, 1], [0], [0]>} : vector<4x16x16xf32>, vector<4x16x16xf32>, vector<4x16x16xf32> -> vector<4x16x16xf32>
    "tpu.trace_stop"() : () -> ()
    %94 = vector.shape_cast %26 : vector<16x16xf32> to vector<1x16x16xf32>
    %95 = vector.broadcast %94 : vector<1x16x16xf32> to vector<4x16x16xf32>
    %96 = arith.addf %93, %95 : vector<4x16x16xf32>
    %cst_30 = arith.constant dense<0xFF800000> : vector<4x16xf32>
    %97 = vector.multi_reduction <maximumf>, %96, %cst_30 [2] : vector<4x16x16xf32> to vector<4x16xf32>
    %98 = vector.shape_cast %97 : vector<4x16xf32> to vector<4x16x1xf32>
    %99 = vector.broadcast %98 : vector<4x16x1xf32> to vector<4x16x16xf32>
    %100 = arith.subf %96, %99 : vector<4x16x16xf32>
    %101 = math.exp %100 : vector<4x16x16xf32>
    %cst_31 = arith.constant dense<0.000000e+00> : vector<4x16xf32>
    %102 = vector.multi_reduction <add>, %101, %cst_31 [2] : vector<4x16x16xf32> to vector<4x16xf32>
    %103 = vector.shape_cast %102 : vector<4x16xf32> to vector<4x16x1xf32>
    %104 = tpu.reciprocal %103 {approx = true} : vector<4x16x1xf32> -> vector<4x16x1xf32>
    %105 = vector.broadcast %104 : vector<4x16x1xf32> to vector<4x16x16xf32>
    %106 = arith.mulf %101, %105 : vector<4x16x16xf32>
    "tpu.trace_start"() <{level = 10 : i32, message = "hqk,hkd->hqd"}> : () -> ()
    %cst_32 = arith.constant dense<0.000000e+00> : vector<4x16x16xf32>
    %107 = tpu.matmul %106, %92, %cst_32 {dimension_numbers = #tpu.dot_dimension_numbers<[2], [1], [1], [2], [0, 0, 0, 1, 1, 2], [0], [0]>} : vector<4x16x16xf32>, vector<4x16x16xf32>, vector<4x16x16xf32> -> vector<4x16x16xf32>
    "tpu.trace_stop"() : () -> ()
    %108 = vector.extract_strided_slice %107 {offsets = [0, 0, 0], sizes = [1, 16, 16], strides = [1, 1, 1]} : vector<4x16x16xf32> to vector<1x16x16xf32>
    %109 = vector.shape_cast %108 : vector<1x16x16xf32> to vector<16x16xf32>
    %110 = vector.extract_strided_slice %107 {offsets = [1, 0, 0], sizes = [1, 16, 16], strides = [1, 1, 1]} : vector<4x16x16xf32> to vector<1x16x16xf32>
    %111 = vector.shape_cast %110 : vector<1x16x16xf32> to vector<16x16xf32>
    %112 = vector.extract_strided_slice %107 {offsets = [2, 0, 0], sizes = [1, 16, 16], strides = [1, 1, 1]} : vector<4x16x16xf32> to vector<1x16x16xf32>
    %113 = vector.shape_cast %112 : vector<1x16x16xf32> to vector<16x16xf32>
    %114 = vector.extract_strided_slice %107 {offsets = [3, 0, 0], sizes = [1, 16, 16], strides = [1, 1, 1]} : vector<4x16x16xf32> to vector<1x16x16xf32>
    %115 = vector.shape_cast %114 : vector<1x16x16xf32> to vector<16x16xf32>
    %116 = tpu.concatenate %109, %111, %113, %115 in 1 : vector<16x16xf32>, vector<16x16xf32>, vector<16x16xf32>, vector<16x16xf32> -> vector<16x64xf32>
    %117 = arith.truncf %116 : vector<16x64xf32> to vector<16x64xbf16>
    %c0_33 = arith.constant 0 : index
    %c0_34 = arith.constant 0 : index
    %c0_35 = arith.constant 0 : index
    %118 = vector.load %arg6[%c0_33, %c0_34, %c0_35] : memref<2x64x64xbf16, #tpu.memory_space<vmem>>, vector<1x64x64xbf16>
    %119 = vector.shape_cast %118 : vector<1x64x64xbf16> to vector<64x64xbf16>
    %cst_36 = arith.constant dense<0.000000e+00> : vector<16x64xf32>
    %120 = tpu.matmul %117, %119, %cst_36 {dimension_numbers = #tpu.dot_dimension_numbers<[1], [0], [0], [1], [0, 0, 1, 1], [], []>} : vector<16x64xbf16>, vector<64x64xbf16>, vector<16x64xf32> -> vector<16x64xf32>
    %c0_37 = arith.constant 0 : index
    %c0_38 = arith.constant 0 : index
    %c0_39 = arith.constant 0 : index
    %121 = vector.load %arg7[%c0_37, %c0_38, %c0_39] : memref<2x1x64xf32, #tpu.memory_space<vmem>>, vector<1x1x64xf32>
    %122 = vector.shape_cast %121 : vector<1x1x64xf32> to vector<1x64xf32>
    %123 = vector.broadcast %122 : vector<1x64xf32> to vector<16x64xf32>
    %124 = arith.addf %120, %123 : vector<16x64xf32>
    %125 = arith.addf %1, %124 : vector<16x64xf32>
    %c0_40 = arith.constant 0 : index
    %c0_41 = arith.constant 0 : index
    %c0_42 = arith.constant 0 : index
    %126 = vector.load %arg8[%c0_40, %c0_41, %c0_42] : memref<2x1x64xf32, #tpu.memory_space<vmem>>, vector<1x1x64xf32>
    %127 = vector.shape_cast %126 : vector<1x1x64xf32> to vector<1x64xf32>
    %c0_43 = arith.constant 0 : index
    %c0_44 = arith.constant 0 : index
    %c0_45 = arith.constant 0 : index
    %128 = vector.load %arg9[%c0_43, %c0_44, %c0_45] : memref<2x1x64xf32, #tpu.memory_space<vmem>>, vector<1x1x64xf32>
    %129 = vector.shape_cast %128 : vector<1x1x64xf32> to vector<1x64xf32>
    %cst_46 = arith.constant dense<0.000000e+00> : vector<16xf32>
    %130 = vector.multi_reduction <add>, %125, %cst_46 [1] : vector<16x64xf32> to vector<16xf32>
    %131 = vector.shape_cast %130 : vector<16xf32> to vector<16x1xf32>
    %cst_47 = arith.constant 6.400000e+01 : f32
    %132 = vector.broadcast %cst_47 : f32 to vector<16x1xf32>
    %133 = arith.divf %131, %132 : vector<16x1xf32>
    %134 = vector.broadcast %133 : vector<16x1xf32> to vector<16x64xf32>
    %135 = arith.subf %125, %134 : vector<16x64xf32>
    %136 = arith.mulf %135, %135 : vector<16x64xf32>
    %cst_48 = arith.constant dense<0.000000e+00> : vector<16xf32>
    %137 = vector.multi_reduction <add>, %136, %cst_48 [1] : vector<16x64xf32> to vector<16xf32>
    %138 = vector.shape_cast %137 : vector<16xf32> to vector<16x1xf32>
    %cst_49 = arith.constant 6.400000e+01 : f32
    %139 = vector.broadcast %cst_49 : f32 to vector<16x1xf32>
    %140 = arith.divf %138, %139 : vector<16x1xf32>
    %141 = vector.broadcast %133 : vector<16x1xf32> to vector<16x64xf32>
    %142 = arith.subf %125, %141 : vector<16x64xf32>
    %cst_50 = arith.constant 9.99999974E-6 : f32
    %143 = vector.broadcast %cst_50 : f32 to vector<16x1xf32>
    %144 = arith.addf %140, %143 : vector<16x1xf32>
    %145 = math.rsqrt %144 : vector<16x1xf32>
    %146 = vector.broadcast %145 : vector<16x1xf32> to vector<16x64xf32>
    %147 = arith.mulf %142, %146 : vector<16x64xf32>
    %148 = vector.broadcast %127 : vector<1x64xf32> to vector<16x64xf32>
    %149 = arith.mulf %147, %148 : vector<16x64xf32>
    %150 = vector.broadcast %129 : vector<1x64xf32> to vector<16x64xf32>
    %151 = arith.addf %149, %150 : vector<16x64xf32>
    %152 = arith.truncf %151 : vector<16x64xf32> to vector<16x64xbf16>
    %c0_51 = arith.constant 0 : index
    %c0_52 = arith.constant 0 : index
    %c0_53 = arith.constant 0 : index
    %153 = vector.load %arg10[%c0_51, %c0_52, %c0_53] : memref<2x64x128xbf16, #tpu.memory_space<vmem>>, vector<1x64x128xbf16>
    %154 = vector.shape_cast %153 : vector<1x64x128xbf16> to vector<64x128xbf16>
    %cst_54 = arith.constant dense<0.000000e+00> : vector<16x128xf32>
    %155 = tpu.matmul %152, %154, %cst_54 {dimension_numbers = #tpu.dot_dimension_numbers<[1], [0], [0], [1], [0, 0, 1, 1], [], []>} : vector<16x64xbf16>, vector<64x128xbf16>, vector<16x128xf32> -> vector<16x128xf32>
    %c0_55 = arith.constant 0 : index
    %c0_56 = arith.constant 0 : index
    %c0_57 = arith.constant 0 : index
    %156 = vector.load %arg11[%c0_55, %c0_56, %c0_57] : memref<2x1x128xf32, #tpu.memory_space<vmem>>, vector<1x1x128xf32>
    %157 = vector.shape_cast %156 : vector<1x1x128xf32> to vector<1x128xf32>
    %158 = vector.broadcast %157 : vector<1x128xf32> to vector<16x128xf32>
    %159 = arith.addf %155, %158 : vector<16x128xf32>
    %cst_58 = arith.constant 0.000000e+00 : f32
    %160 = vector.broadcast %cst_58 : f32 to vector<16x128xf32>
    %161 = arith.maximumf %159, %160 : vector<16x128xf32>
    %162 = arith.truncf %161 : vector<16x128xf32> to vector<16x128xbf16>
    %c0_59 = arith.constant 0 : index
    %c0_60 = arith.constant 0 : index
    %c0_61 = arith.constant 0 : index
    %163 = vector.load %arg12[%c0_59, %c0_60, %c0_61] : memref<2x128x64xbf16, #tpu.memory_space<vmem>>, vector<1x128x64xbf16>
    %164 = vector.shape_cast %163 : vector<1x128x64xbf16> to vector<128x64xbf16>
    %cst_62 = arith.constant dense<0.000000e+00> : vector<16x64xf32>
    %165 = tpu.matmul %162, %164, %cst_62 {dimension_numbers = #tpu.dot_dimension_numbers<[1], [0], [0], [1], [0, 0, 1, 1], [], []>} : vector<16x128xbf16>, vector<128x64xbf16>, vector<16x64xf32> -> vector<16x64xf32>
    %c0_63 = arith.constant 0 : index
    %c0_64 = arith.constant 0 : index
    %c0_65 = arith.constant 0 : index
    %166 = vector.load %arg13[%c0_63, %c0_64, %c0_65] : memref<2x1x64xf32, #tpu.memory_space<vmem>>, vector<1x1x64xf32>
    %167 = vector.shape_cast %166 : vector<1x1x64xf32> to vector<1x64xf32>
    %168 = vector.broadcast %167 : vector<1x64xf32> to vector<16x64xf32>
    %169 = arith.addf %165, %168 : vector<16x64xf32>
    %170 = arith.addf %125, %169 : vector<16x64xf32>
    %c1 = arith.constant 1 : index
    %c0_66 = arith.constant 0 : index
    %c0_67 = arith.constant 0 : index
    %171 = vector.load %arg2[%c1, %c0_66, %c0_67] : memref<2x1x64xf32, #tpu.memory_space<vmem>>, vector<1x1x64xf32>
    %172 = vector.shape_cast %171 : vector<1x1x64xf32> to vector<1x64xf32>
    %c1_68 = arith.constant 1 : index
    %c0_69 = arith.constant 0 : index
    %c0_70 = arith.constant 0 : index
    %173 = vector.load %arg3[%c1_68, %c0_69, %c0_70] : memref<2x1x64xf32, #tpu.memory_space<vmem>>, vector<1x1x64xf32>
    %174 = vector.shape_cast %173 : vector<1x1x64xf32> to vector<1x64xf32>
    %cst_71 = arith.constant dense<0.000000e+00> : vector<16xf32>
    %175 = vector.multi_reduction <add>, %170, %cst_71 [1] : vector<16x64xf32> to vector<16xf32>
    %176 = vector.shape_cast %175 : vector<16xf32> to vector<16x1xf32>
    %cst_72 = arith.constant 6.400000e+01 : f32
    %177 = vector.broadcast %cst_72 : f32 to vector<16x1xf32>
    %178 = arith.divf %176, %177 : vector<16x1xf32>
    %179 = vector.broadcast %178 : vector<16x1xf32> to vector<16x64xf32>
    %180 = arith.subf %170, %179 : vector<16x64xf32>
    %181 = arith.mulf %180, %180 : vector<16x64xf32>
    %cst_73 = arith.constant dense<0.000000e+00> : vector<16xf32>
    %182 = vector.multi_reduction <add>, %181, %cst_73 [1] : vector<16x64xf32> to vector<16xf32>
    %183 = vector.shape_cast %182 : vector<16xf32> to vector<16x1xf32>
    %cst_74 = arith.constant 6.400000e+01 : f32
    %184 = vector.broadcast %cst_74 : f32 to vector<16x1xf32>
    %185 = arith.divf %183, %184 : vector<16x1xf32>
    %186 = vector.broadcast %178 : vector<16x1xf32> to vector<16x64xf32>
    %187 = arith.subf %170, %186 : vector<16x64xf32>
    %cst_75 = arith.constant 9.99999974E-6 : f32
    %188 = vector.broadcast %cst_75 : f32 to vector<16x1xf32>
    %189 = arith.addf %185, %188 : vector<16x1xf32>
    %190 = math.rsqrt %189 : vector<16x1xf32>
    %191 = vector.broadcast %190 : vector<16x1xf32> to vector<16x64xf32>
    %192 = arith.mulf %187, %191 : vector<16x64xf32>
    %193 = vector.broadcast %172 : vector<1x64xf32> to vector<16x64xf32>
    %194 = arith.mulf %192, %193 : vector<16x64xf32>
    %195 = vector.broadcast %174 : vector<1x64xf32> to vector<16x64xf32>
    %196 = arith.addf %194, %195 : vector<16x64xf32>
    %197 = arith.truncf %196 : vector<16x64xf32> to vector<16x64xbf16>
    %c1_76 = arith.constant 1 : index
    %c0_77 = arith.constant 0 : index
    %c0_78 = arith.constant 0 : index
    %198 = vector.load %arg4[%c1_76, %c0_77, %c0_78] : memref<2x64x192xbf16, #tpu.memory_space<vmem>>, vector<1x64x192xbf16>
    %199 = vector.shape_cast %198 : vector<1x64x192xbf16> to vector<64x192xbf16>
    %cst_79 = arith.constant dense<0.000000e+00> : vector<16x192xf32>
    %200 = tpu.matmul %197, %199, %cst_79 {dimension_numbers = #tpu.dot_dimension_numbers<[1], [0], [0], [1], [0, 0, 1, 1], [], []>} : vector<16x64xbf16>, vector<64x192xbf16>, vector<16x192xf32> -> vector<16x192xf32>
    %c1_80 = arith.constant 1 : index
    %c0_81 = arith.constant 0 : index
    %c0_82 = arith.constant 0 : index
    %201 = vector.load %arg5[%c1_80, %c0_81, %c0_82] : memref<2x1x192xf32, #tpu.memory_space<vmem>>, vector<1x1x192xf32>
    %202 = vector.shape_cast %201 : vector<1x1x192xf32> to vector<1x192xf32>
    %203 = vector.broadcast %202 : vector<1x192xf32> to vector<16x192xf32>
    %204 = arith.addf %200, %203 : vector<16x192xf32>
    %205 = vector.extract_strided_slice %204 {offsets = [0, 0], sizes = [16, 64], strides = [1, 1]} : vector<16x192xf32> to vector<16x64xf32>
    %cst_83 = arith.constant 2.500000e-01 : f32
    %206 = vector.broadcast %cst_83 : f32 to vector<16x64xf32>
    %207 = arith.mulf %205, %206 : vector<16x64xf32>
    %208 = vector.extract_strided_slice %204 {offsets = [0, 64], sizes = [16, 64], strides = [1, 1]} : vector<16x192xf32> to vector<16x64xf32>
    %209 = vector.extract_strided_slice %204 {offsets = [0, 128], sizes = [16, 64], strides = [1, 1]} : vector<16x192xf32> to vector<16x64xf32>
    %210 = vector.extract_strided_slice %207 {offsets = [0, 0], sizes = [16, 16], strides = [1, 1]} : vector<16x64xf32> to vector<16x16xf32>
    %211 = vector.extract_strided_slice %207 {offsets = [0, 16], sizes = [16, 16], strides = [1, 1]} : vector<16x64xf32> to vector<16x16xf32>
    %212 = vector.extract_strided_slice %207 {offsets = [0, 32], sizes = [16, 16], strides = [1, 1]} : vector<16x64xf32> to vector<16x16xf32>
    %213 = vector.extract_strided_slice %207 {offsets = [0, 48], sizes = [16, 16], strides = [1, 1]} : vector<16x64xf32> to vector<16x16xf32>
    %214 = vector.shape_cast %210 : vector<16x16xf32> to vector<1x16x16xf32>
    %215 = vector.shape_cast %211 : vector<16x16xf32> to vector<1x16x16xf32>
    %216 = vector.shape_cast %212 : vector<16x16xf32> to vector<1x16x16xf32>
    %217 = vector.shape_cast %213 : vector<16x16xf32> to vector<1x16x16xf32>
    %218 = tpu.concatenate %214, %215, %216, %217 in 0 : vector<1x16x16xf32>, vector<1x16x16xf32>, vector<1x16x16xf32>, vector<1x16x16xf32> -> vector<4x16x16xf32>
    %219 = vector.extract_strided_slice %208 {offsets = [0, 0], sizes = [16, 16], strides = [1, 1]} : vector<16x64xf32> to vector<16x16xf32>
    %220 = vector.extract_strided_slice %208 {offsets = [0, 16], sizes = [16, 16], strides = [1, 1]} : vector<16x64xf32> to vector<16x16xf32>
    %221 = vector.extract_strided_slice %208 {offsets = [0, 32], sizes = [16, 16], strides = [1, 1]} : vector<16x64xf32> to vector<16x16xf32>
    %222 = vector.extract_strided_slice %208 {offsets = [0, 48], sizes = [16, 16], strides = [1, 1]} : vector<16x64xf32> to vector<16x16xf32>
    %223 = vector.shape_cast %219 : vector<16x16xf32> to vector<1x16x16xf32>
    %224 = vector.shape_cast %220 : vector<16x16xf32> to vector<1x16x16xf32>
    %225 = vector.shape_cast %221 : vector<16x16xf32> to vector<1x16x16xf32>
    %226 = vector.shape_cast %222 : vector<16x16xf32> to vector<1x16x16xf32>
    %227 = tpu.concatenate %223, %224, %225, %226 in 0 : vector<1x16x16xf32>, vector<1x16x16xf32>, vector<1x16x16xf32>, vector<1x16x16xf32> -> vector<4x16x16xf32>
    %228 = vector.extract_strided_slice %209 {offsets = [0, 0], sizes = [16, 16], strides = [1, 1]} : vector<16x64xf32> to vector<16x16xf32>
    %229 = vector.extract_strided_slice %209 {offsets = [0, 16], sizes = [16, 16], strides = [1, 1]} : vector<16x64xf32> to vector<16x16xf32>
    %230 = vector.extract_strided_slice %209 {offsets = [0, 32], sizes = [16, 16], strides = [1, 1]} : vector<16x64xf32> to vector<16x16xf32>
    %231 = vector.extract_strided_slice %209 {offsets = [0, 48], sizes = [16, 16], strides = [1, 1]} : vector<16x64xf32> to vector<16x16xf32>
    %232 = vector.shape_cast %228 : vector<16x16xf32> to vector<1x16x16xf32>
    %233 = vector.shape_cast %229 : vector<16x16xf32> to vector<1x16x16xf32>
    %234 = vector.shape_cast %230 : vector<16x16xf32> to vector<1x16x16xf32>
    %235 = vector.shape_cast %231 : vector<16x16xf32> to vector<1x16x16xf32>
    %236 = tpu.concatenate %232, %233, %234, %235 in 0 : vector<1x16x16xf32>, vector<1x16x16xf32>, vector<1x16x16xf32>, vector<1x16x16xf32> -> vector<4x16x16xf32>
    "tpu.trace_start"() <{level = 10 : i32, message = "hqd,hkd->hqk"}> : () -> ()
    %cst_84 = arith.constant dense<0.000000e+00> : vector<4x16x16xf32>
    %237 = tpu.matmul %218, %227, %cst_84 {dimension_numbers = #tpu.dot_dimension_numbers<[2], [2], [1], [1], [0, 0, 0, 1, 1, 1], [0], [0]>} : vector<4x16x16xf32>, vector<4x16x16xf32>, vector<4x16x16xf32> -> vector<4x16x16xf32>
    "tpu.trace_stop"() : () -> ()
    %238 = vector.shape_cast %26 : vector<16x16xf32> to vector<1x16x16xf32>
    %239 = vector.broadcast %238 : vector<1x16x16xf32> to vector<4x16x16xf32>
    %240 = arith.addf %237, %239 : vector<4x16x16xf32>
    %cst_85 = arith.constant dense<0xFF800000> : vector<4x16xf32>
    %241 = vector.multi_reduction <maximumf>, %240, %cst_85 [2] : vector<4x16x16xf32> to vector<4x16xf32>
    %242 = vector.shape_cast %241 : vector<4x16xf32> to vector<4x16x1xf32>
    %243 = vector.broadcast %242 : vector<4x16x1xf32> to vector<4x16x16xf32>
    %244 = arith.subf %240, %243 : vector<4x16x16xf32>
    %245 = math.exp %244 : vector<4x16x16xf32>
    %cst_86 = arith.constant dense<0.000000e+00> : vector<4x16xf32>
    %246 = vector.multi_reduction <add>, %245, %cst_86 [2] : vector<4x16x16xf32> to vector<4x16xf32>
    %247 = vector.shape_cast %246 : vector<4x16xf32> to vector<4x16x1xf32>
    %248 = tpu.reciprocal %247 {approx = true} : vector<4x16x1xf32> -> vector<4x16x1xf32>
    %249 = vector.broadcast %248 : vector<4x16x1xf32> to vector<4x16x16xf32>
    %250 = arith.mulf %245, %249 : vector<4x16x16xf32>
    "tpu.trace_start"() <{level = 10 : i32, message = "hqk,hkd->hqd"}> : () -> ()
    %cst_87 = arith.constant dense<0.000000e+00> : vector<4x16x16xf32>
    %251 = tpu.matmul %250, %236, %cst_87 {dimension_numbers = #tpu.dot_dimension_numbers<[2], [1], [1], [2], [0, 0, 0, 1, 1, 2], [0], [0]>} : vector<4x16x16xf32>, vector<4x16x16xf32>, vector<4x16x16xf32> -> vector<4x16x16xf32>
    "tpu.trace_stop"() : () -> ()
    %252 = vector.extract_strided_slice %251 {offsets = [0, 0, 0], sizes = [1, 16, 16], strides = [1, 1, 1]} : vector<4x16x16xf32> to vector<1x16x16xf32>
    %253 = vector.shape_cast %252 : vector<1x16x16xf32> to vector<16x16xf32>
    %254 = vector.extract_strided_slice %251 {offsets = [1, 0, 0], sizes = [1, 16, 16], strides = [1, 1, 1]} : vector<4x16x16xf32> to vector<1x16x16xf32>
    %255 = vector.shape_cast %254 : vector<1x16x16xf32> to vector<16x16xf32>
    %256 = vector.extract_strided_slice %251 {offsets = [2, 0, 0], sizes = [1, 16, 16], strides = [1, 1, 1]} : vector<4x16x16xf32> to vector<1x16x16xf32>
    %257 = vector.shape_cast %256 : vector<1x16x16xf32> to vector<16x16xf32>
    %258 = vector.extract_strided_slice %251 {offsets = [3, 0, 0], sizes = [1, 16, 16], strides = [1, 1, 1]} : vector<4x16x16xf32> to vector<1x16x16xf32>
    %259 = vector.shape_cast %258 : vector<1x16x16xf32> to vector<16x16xf32>
    %260 = tpu.concatenate %253, %255, %257, %259 in 1 : vector<16x16xf32>, vector<16x16xf32>, vector<16x16xf32>, vector<16x16xf32> -> vector<16x64xf32>
    %261 = arith.truncf %260 : vector<16x64xf32> to vector<16x64xbf16>
    %c1_88 = arith.constant 1 : index
    %c0_89 = arith.constant 0 : index
    %c0_90 = arith.constant 0 : index
    %262 = vector.load %arg6[%c1_88, %c0_89, %c0_90] : memref<2x64x64xbf16, #tpu.memory_space<vmem>>, vector<1x64x64xbf16>
    %263 = vector.shape_cast %262 : vector<1x64x64xbf16> to vector<64x64xbf16>
    %cst_91 = arith.constant dense<0.000000e+00> : vector<16x64xf32>
    %264 = tpu.matmul %261, %263, %cst_91 {dimension_numbers = #tpu.dot_dimension_numbers<[1], [0], [0], [1], [0, 0, 1, 1], [], []>} : vector<16x64xbf16>, vector<64x64xbf16>, vector<16x64xf32> -> vector<16x64xf32>
    %c1_92 = arith.constant 1 : index
    %c0_93 = arith.constant 0 : index
    %c0_94 = arith.constant 0 : index
    %265 = vector.load %arg7[%c1_92, %c0_93, %c0_94] : memref<2x1x64xf32, #tpu.memory_space<vmem>>, vector<1x1x64xf32>
    %266 = vector.shape_cast %265 : vector<1x1x64xf32> to vector<1x64xf32>
    %267 = vector.broadcast %266 : vector<1x64xf32> to vector<16x64xf32>
    %268 = arith.addf %264, %267 : vector<16x64xf32>
    %269 = arith.addf %170, %268 : vector<16x64xf32>
    %c1_95 = arith.constant 1 : index
    %c0_96 = arith.constant 0 : index
    %c0_97 = arith.constant 0 : index
    %270 = vector.load %arg8[%c1_95, %c0_96, %c0_97] : memref<2x1x64xf32, #tpu.memory_space<vmem>>, vector<1x1x64xf32>
    %271 = vector.shape_cast %270 : vector<1x1x64xf32> to vector<1x64xf32>
    %c1_98 = arith.constant 1 : index
    %c0_99 = arith.constant 0 : index
    %c0_100 = arith.constant 0 : index
    %272 = vector.load %arg9[%c1_98, %c0_99, %c0_100] : memref<2x1x64xf32, #tpu.memory_space<vmem>>, vector<1x1x64xf32>
    %273 = vector.shape_cast %272 : vector<1x1x64xf32> to vector<1x64xf32>
    %cst_101 = arith.constant dense<0.000000e+00> : vector<16xf32>
    %274 = vector.multi_reduction <add>, %269, %cst_101 [1] : vector<16x64xf32> to vector<16xf32>
    %275 = vector.shape_cast %274 : vector<16xf32> to vector<16x1xf32>
    %cst_102 = arith.constant 6.400000e+01 : f32
    %276 = vector.broadcast %cst_102 : f32 to vector<16x1xf32>
    %277 = arith.divf %275, %276 : vector<16x1xf32>
    %278 = vector.broadcast %277 : vector<16x1xf32> to vector<16x64xf32>
    %279 = arith.subf %269, %278 : vector<16x64xf32>
    %280 = arith.mulf %279, %279 : vector<16x64xf32>
    %cst_103 = arith.constant dense<0.000000e+00> : vector<16xf32>
    %281 = vector.multi_reduction <add>, %280, %cst_103 [1] : vector<16x64xf32> to vector<16xf32>
    %282 = vector.shape_cast %281 : vector<16xf32> to vector<16x1xf32>
    %cst_104 = arith.constant 6.400000e+01 : f32
    %283 = vector.broadcast %cst_104 : f32 to vector<16x1xf32>
    %284 = arith.divf %282, %283 : vector<16x1xf32>
    %285 = vector.broadcast %277 : vector<16x1xf32> to vector<16x64xf32>
    %286 = arith.subf %269, %285 : vector<16x64xf32>
    %cst_105 = arith.constant 9.99999974E-6 : f32
    %287 = vector.broadcast %cst_105 : f32 to vector<16x1xf32>
    %288 = arith.addf %284, %287 : vector<16x1xf32>
    %289 = math.rsqrt %288 : vector<16x1xf32>
    %290 = vector.broadcast %289 : vector<16x1xf32> to vector<16x64xf32>
    %291 = arith.mulf %286, %290 : vector<16x64xf32>
    %292 = vector.broadcast %271 : vector<1x64xf32> to vector<16x64xf32>
    %293 = arith.mulf %291, %292 : vector<16x64xf32>
    %294 = vector.broadcast %273 : vector<1x64xf32> to vector<16x64xf32>
    %295 = arith.addf %293, %294 : vector<16x64xf32>
    %296 = arith.truncf %295 : vector<16x64xf32> to vector<16x64xbf16>
    %c1_106 = arith.constant 1 : index
    %c0_107 = arith.constant 0 : index
    %c0_108 = arith.constant 0 : index
    %297 = vector.load %arg10[%c1_106, %c0_107, %c0_108] : memref<2x64x128xbf16, #tpu.memory_space<vmem>>, vector<1x64x128xbf16>
    %298 = vector.shape_cast %297 : vector<1x64x128xbf16> to vector<64x128xbf16>
    %cst_109 = arith.constant dense<0.000000e+00> : vector<16x128xf32>
    %299 = tpu.matmul %296, %298, %cst_109 {dimension_numbers = #tpu.dot_dimension_numbers<[1], [0], [0], [1], [0, 0, 1, 1], [], []>} : vector<16x64xbf16>, vector<64x128xbf16>, vector<16x128xf32> -> vector<16x128xf32>
    %c1_110 = arith.constant 1 : index
    %c0_111 = arith.constant 0 : index
    %c0_112 = arith.constant 0 : index
    %300 = vector.load %arg11[%c1_110, %c0_111, %c0_112] : memref<2x1x128xf32, #tpu.memory_space<vmem>>, vector<1x1x128xf32>
    %301 = vector.shape_cast %300 : vector<1x1x128xf32> to vector<1x128xf32>
    %302 = vector.broadcast %301 : vector<1x128xf32> to vector<16x128xf32>
    %303 = arith.addf %299, %302 : vector<16x128xf32>
    %cst_113 = arith.constant 0.000000e+00 : f32
    %304 = vector.broadcast %cst_113 : f32 to vector<16x128xf32>
    %305 = arith.maximumf %303, %304 : vector<16x128xf32>
    %306 = arith.truncf %305 : vector<16x128xf32> to vector<16x128xbf16>
    %c1_114 = arith.constant 1 : index
    %c0_115 = arith.constant 0 : index
    %c0_116 = arith.constant 0 : index
    %307 = vector.load %arg12[%c1_114, %c0_115, %c0_116] : memref<2x128x64xbf16, #tpu.memory_space<vmem>>, vector<1x128x64xbf16>
    %308 = vector.shape_cast %307 : vector<1x128x64xbf16> to vector<128x64xbf16>
    %cst_117 = arith.constant dense<0.000000e+00> : vector<16x64xf32>
    %309 = tpu.matmul %306, %308, %cst_117 {dimension_numbers = #tpu.dot_dimension_numbers<[1], [0], [0], [1], [0, 0, 1, 1], [], []>} : vector<16x128xbf16>, vector<128x64xbf16>, vector<16x64xf32> -> vector<16x64xf32>
    %c1_118 = arith.constant 1 : index
    %c0_119 = arith.constant 0 : index
    %c0_120 = arith.constant 0 : index
    %310 = vector.load %arg13[%c1_118, %c0_119, %c0_120] : memref<2x1x64xf32, #tpu.memory_space<vmem>>, vector<1x1x64xf32>
    %311 = vector.shape_cast %310 : vector<1x1x64xf32> to vector<1x64xf32>
    %312 = vector.broadcast %311 : vector<1x64xf32> to vector<16x64xf32>
    %313 = arith.addf %309, %312 : vector<16x64xf32>
    %314 = arith.addf %269, %313 : vector<16x64xf32>
    %c0_121 = arith.constant 0 : index
    %c0_122 = arith.constant 0 : index
    %315 = vector.load %arg14[%c0_121, %c0_122] : memref<1x64xf32, #tpu.memory_space<vmem>>, vector<1x64xf32>
    %c0_123 = arith.constant 0 : index
    %c0_124 = arith.constant 0 : index
    %316 = vector.load %arg15[%c0_123, %c0_124] : memref<1x64xf32, #tpu.memory_space<vmem>>, vector<1x64xf32>
    %cst_125 = arith.constant dense<0.000000e+00> : vector<16xf32>
    %317 = vector.multi_reduction <add>, %314, %cst_125 [1] : vector<16x64xf32> to vector<16xf32>
    %318 = vector.shape_cast %317 : vector<16xf32> to vector<16x1xf32>
    %cst_126 = arith.constant 6.400000e+01 : f32
    %319 = vector.broadcast %cst_126 : f32 to vector<16x1xf32>
    %320 = arith.divf %318, %319 : vector<16x1xf32>
    %321 = vector.broadcast %320 : vector<16x1xf32> to vector<16x64xf32>
    %322 = arith.subf %314, %321 : vector<16x64xf32>
    %323 = arith.mulf %322, %322 : vector<16x64xf32>
    %cst_127 = arith.constant dense<0.000000e+00> : vector<16xf32>
    %324 = vector.multi_reduction <add>, %323, %cst_127 [1] : vector<16x64xf32> to vector<16xf32>
    %325 = vector.shape_cast %324 : vector<16xf32> to vector<16x1xf32>
    %cst_128 = arith.constant 6.400000e+01 : f32
    %326 = vector.broadcast %cst_128 : f32 to vector<16x1xf32>
    %327 = arith.divf %325, %326 : vector<16x1xf32>
    %328 = vector.broadcast %320 : vector<16x1xf32> to vector<16x64xf32>
    %329 = arith.subf %314, %328 : vector<16x64xf32>
    %cst_129 = arith.constant 9.99999974E-6 : f32
    %330 = vector.broadcast %cst_129 : f32 to vector<16x1xf32>
    %331 = arith.addf %327, %330 : vector<16x1xf32>
    %332 = math.rsqrt %331 : vector<16x1xf32>
    %333 = vector.broadcast %332 : vector<16x1xf32> to vector<16x64xf32>
    %334 = arith.mulf %329, %333 : vector<16x64xf32>
    %335 = vector.broadcast %315 : vector<1x64xf32> to vector<16x64xf32>
    %336 = arith.mulf %334, %335 : vector<16x64xf32>
    %337 = vector.broadcast %316 : vector<1x64xf32> to vector<16x64xf32>
    %338 = arith.addf %336, %337 : vector<16x64xf32>
    %339 = vector.shape_cast %338 : vector<16x64xf32> to vector<2x8x64xf32>
    %c0_130 = arith.constant 0 : index
    %c0_131 = arith.constant 0 : index
    %c0_132 = arith.constant 0 : index
    %340 = vector.load %arg16[%c0_130, %c0_131, %c0_132] : memref<2x8x64xf32, #tpu.memory_space<vmem>>, vector<2x8x64xf32>
    tpu.vector_store %arg16[%c0_130, %c0_131, %c0_132], %339 {strides = array<i32>} : memref<2x8x64xf32, #tpu.memory_space<vmem>>, vector<2x8x64xf32>,
    return
  }
}

</mosaic_0001>

<bundles_post_ra>
// kernel: tpu_custom_call.1
= control target key start
LH: loop header
LB: loop body
LE: loop exit
PB: predicated region body
PF: predicated region fallthrough
CT: control target
= control target key end

     0   :  { %s4290_s0 = inlined_call_operand.hbm [shape: f32[2,8,64], index: 0, kind: input, shape index: {}]   ;;  %s4291_s1 = inlined_call_operand.hbm [shape: f32[1,16], index: 1, kind: input, shape index: {}]   ;;  %s4292_s2 = inlined_call_operand.vmem [shape: f32[2,1,64], index: 2, kind: input, shape index: {}]   ;;  %s4293_s3 = inlined_call_operand.hbm [shape: f32[2,1,64], index: 3, kind: input, shape index: {}]   ;;  %s4294_s4 = inlined_call_operand.vmem [shape: bf16[2,64,192], index: 4, kind: input, shape index: {}]   ;;  %s4295_s5 = inlined_call_operand.vmem [shape: f32[2,1,192], index: 5, kind: input, shape index: {}]   ;;  %s4296_s6 = inlined_call_operand.vmem [shape: bf16[2,64,64], index: 6, kind: input, shape index: {}]   ;;  %s4297_s7 = inlined_call_operand.vmem [shape: f32[2,1,64], index: 7, kind: input, shape index: {}]   ;;  %s4298_s8 = inlined_call_operand.vmem [shape: f32[2,1,64], index: 8, kind: input, shape index: {}]   ;;  %s4299_s9 = inlined_call_operand.vmem [shape: f32[2,1,64], index: 9, kind: input, shape index: {}]   ;;  %s4300_s10 = inlined_call_operand.hbm [shape: bf16[2,64,128], index: 10, kind: input, shape index: {}]   ;;  %s4301_s11 = inlined_call_operand.vmem [shape: f32[2,1,128], index: 11, kind: input, shape index: {}]   ;;  %s4302_s12 = inlined_call_operand.vmem [shape: bf16[2,128,64], index: 12, kind: input, shape index: {}]   ;;  %s4303_s13 = inlined_call_operand.vmem [shape: f32[2,1,64], index: 13, kind: input, shape index: {}]   ;;  %s4304_s14 = inlined_call_operand.vmem [shape: f32[1,64], index: 14, kind: input, shape index: {}]   ;;  %s4305_s15 = inlined_call_operand.vmem [shape: f32[1,64], index: 15, kind: input, shape index: {}]   ;;  %s4306_s16 = inlined_call_operand.hbm [shape: f32[2,8,64], index: 16, kind: output, shape index: {}]  }
   0x1   :  { %4308 = sst [smem:[#allocation15_spill]] %s4290_s0 }
   0x2   :  { %21 = vsyncpa [#allocation3], 0 }
   0x3   :  { %22 = vsyncpa [#allocation6], 0 }
   0x4   :  { %23 = vsyncpa [#allocation9], 0 }
   0x5   :  { %24 = vsyncpa [#allocation4], 0  ;;  %s3626_s21 = smov [#allocation5]   ;;  %s3627_s23 = smov [#allocation2]  }
   0x6   :  { %s43_s22 = sshll.u32 %s3626_s21, 4  ;;  %s30_s24 = sshll.u32 %s3627_s23, 4  ;;  %s44_s22 = int_to_ptr.vmem [resolvable:$true] %s43_s22  ;;  %s31_s24 = int_to_ptr.vmem [resolvable:$true] %s30_s24 }
   0x7   :  { %s3526_s25 = scalar_lea.vmem %s44_s22, 16  ;;  %s3530_s26 = scalar_lea.vmem %s44_s22, 32 }
   0x8   :  { %p3527_p0 = scmp.ne.s32.totalorder %s44_s22, %s3526_s25  ;;  %p3531_p1 = scmp.lt.s32.totalorder %s44_s22, %s44_s22 }
   0x9   :  { %p3532_p2 = scmp.lt.s32.totalorder %s3530_s26, %s3526_s25 }
   0xb   :  { %p3533_p3 = por %p3532_p2, %p3531_p1 }
   0xd   :  { %p3534_p4 = pnand %p3533_p3, %p3527_p0 }
   0xf   :  { %3537 = shalt.err (!%p3534_p4)
}
  0x10   :  { %46 = dma.hbm_to_vmem [thread:$0]  %s4291_s1, 16, %s44_s22, [#allocation6]  }
  0x11   :  { %s3546_s29 = scalar_lea.vmem %s31_s24, 256  ;;  %p3551_p6 = scmp.lt.s32.totalorder %s31_s24, %s31_s24 }
  0x12   :  { %p3547_p5 = scmp.ne.s32.totalorder %s31_s24, %s3546_s29  ;;  %p3552_p7 = scmp.lt.s32.totalorder %s3546_s29, %s3546_s29 }
  0x14   :  { %p3553_p8 = por %p3552_p7, %p3551_p6 }
  0x16   :  { %p3554_p9 = pnand %p3553_p8, %p3547_p5 }
  0x18   :  { %3557 = shalt.err (!%p3554_p9)
}
  0x19   :  { %s4307_s30 = smov 128   ;;  %s3629_s0 = smov 8  }
  0x1a   :  { %s4309_s19 = sld [smem:[#allocation15_spill]]  ;;  %s3630_s20 = smov [#allocation7]  }
  0x1b   :  { %s54_s21 = sshll.u32 %s3630_s20, 4  ;;  %s55_s21 = int_to_ptr.vmem [resolvable:$true] %s54_s21 }
  0x1c   :  { %s3566_s1 = scalar_lea.vmem %s55_s21, 32  ;;  %p3571_p11 = scmp.lt.s32.totalorder %s55_s21, %s55_s21 }
  0x1d   :  { %p3567_p10 = scmp.ne.s32.totalorder %s55_s21, %s3566_s1  ;;  %p3572_p12 = scmp.lt.s32.totalorder %s3566_s1, %s3566_s1 }
  0x1f   :  { %p3573_p13 = por %p3572_p12, %p3571_p11 }
  0x20   :  { %36 = dma.hbm_to_vmem [thread:$0]  %s4309_s19, 256, %s31_s24, [#allocation3], %s4307_s30, %s4307_s30, %s3629_s0  }
  0x21   :  { %p3574_p0 = pnand %p3573_p13, %p3567_p10 }
  0x23   :  { %3577 = shalt.err (!%p3574_p0)
}
  0x24   :  { %s3631_s22 = smov 16   ;;  %s3632_s23 = smov 1  }
  0x25   :  { %60 = dma.hbm_to_vmem [thread:$0]  %s4293_s3, 32, %s55_s21, [#allocation6], %s3631_s22, %s3631_s22, %s3632_s23  }
  0x26   :  { %s3633_s27 = smov [#allocation8]  }
  0x27   :  { %s78_s24 = sshll.u32 %s3633_s27, 4  ;;  %s79_s24 = int_to_ptr.vmem [resolvable:$true] %s78_s24 }
  0x28   :  { %s3586_s28 = scalar_lea.vmem %s79_s24, 1024  ;;  %p3591_p2 = scmp.lt.s32.totalorder %s79_s24, %s79_s24 }
  0x29   :  { %p3587_p1 = scmp.ne.s32.totalorder %s79_s24, %s3586_s28  ;;  %p3592_p3 = scmp.lt.s32.totalorder %s3586_s28, %s3586_s28 }
  0x2b   :  { %p3593_p4 = por %p3592_p3, %p3591_p2 }
  0x2d   :  { %p3594_p5 = pnand %p3593_p4, %p3587_p1 }
  0x2f   :  { %3597 = shalt.err (!%p3594_p5)
}
  0x30   :  { %s3634_s29 = smov 64   ;;  %s3635_s17 = smov 4  }
  0x31   :  { %84 = dma.hbm_to_vmem [thread:$0]  %s4300_s10, 1024, %s79_s24, [#allocation9], %s3634_s29, %s3634_s29, %s3635_s17  }
  0x32   :  { %3618 = dma.done.wait [#allocation3], 256  }
  0x33   :  { %3619 = vsyncadd [#allocation3], 4294967040 }
  0x34   :  { %3620 = dma.done.wait [#allocation6], 48  }
  0x35   :  { %3621 = vsyncadd [#allocation6], 4294967248 }
  0x36   :  { %3622 = dma.done.wait [#allocation9], 1024  }
  0x37   :  { %3623 = vsyncadd [#allocation9], 4294966272  ;;  %vm145_vm0 = vcmask 523264   ;;  %v3750_v0 = vld [vmem:[#allocation2] sm:$0xff]  ;;  %v3752_v1 = vld [vmem:[#allocation2 + $0x8] sm:$0xff]  ;;  %v3636_v19 = vmov 0   ;;  %v111_v40 = vlaneseq }
  0x38   :  { %v146_v2 = vsel %vm145_vm0, %v3750_v0, 0.0  ;;  %v149_v3 = vsel %vm145_vm0, %v3752_v1, 0.0  ;;  %v3378_v14 = vld [vmem:[%s4294_s4 + $0x34] ss:$8 sps:$4 sm:$0xff]   ;;  %v3380_v15 = vld [vmem:[%s4294_s4 + $0x30] ss:$8 sps:$4 sm:$0xff]   ;;  %285 = vmatprep.mubr.bf16.mxu1 %v3636_v19 }
  0x39   :  { %147 = vadd.xlane.f32.xlu0 %v146_v2  ;;  %v3381_v16 = vld [vmem:[%s4294_s4 + $0x24] ss:$8 sps:$4 sm:$0xff]   ;;  %261 = vmatprep.subr.bf16.mxu1 %v3378_v14  ;;  %v3383_v17 = vld [vmem:[%s4294_s4 + $0x20] ss:$8 sps:$4 sm:$0xff]   ;;  %v3384_v18 = vld [vmem:[%s4294_s4 + $0x14] ss:$8 sps:$4 sm:$0xff]  }
  0x3a   :  { %262 = vmatpush1.bf16.msra.mxu1 %v3380_v15  ;;  %v3386_v20 = vld [vmem:[%s4294_s4 + $0x10] ss:$8 sps:$4 sm:$0xff]   ;;  %v3387_v21 = vld [vmem:[%s4294_s4 + $0x4] ss:$8 sps:$4 sm:$0xff]   ;;  %v3389_v22 = vld [vmem:[%s4294_s4] ss:$8 sps:$4 sm:$0xff]  }
  0x3b   :  { %263 = vmatprep.subr.bf16.mxu1 %v3381_v16  ;;  %v2869_v31 = vld [vmem:[%s4292_s2] ss:$0 sm:$0xff]  ;;  %v2870_v35 = vld [vmem:[#allocation7] ss:$0 sm:$0xff]  ;;  %v3792_v41 = vshrl.u32 %v111_v40, 7  ;;  %vm350_vm1 = vcmask 130048  }
  0x3c   :  { %v3800_v43 = vld [vmem:[%s4295_s5] sm:$0x3]  ;;  %s3637_s25 = smov 112   ;;  %s3638_s26 = smov 96   ;;  %v110_v15 = vld [vmem:[#allocation5] sm:$0x1] }
  0x3d   :  { %150 = vadd.xlane.f32.xlu0 %v149_v3  ;;  %v3795_v42 = vsub.s32 0, %v3792_v41  ;;  %s3639_s27 = smov 80   ;;  %v206_v3 = vsub.s32 1, %v3792_v41  ;;  %v113_v16 = vadd.s32 8, %v3792_v41  ;;  %vm126_vm2 = vcmp.gt.f32.partialorder %v110_v15, 0.0  ;;  %s3643_s21 = smov 32  }
  0x3e   :  { %264 = vmatpush1.bf16.msra.mxu1 %v3383_v17  ;;  %v115_v17 = vand.u32 127, %v111_v40  ;;  %vm3642_vm12 = vmmov 0   ;;  %s3644_s1 = smov 48   ;;  %vm1133_vm13 = vcmask 261120   ;;  %vm1136_vm14 = vcmask 392192  }
  0x3f   :  { %265 = vmatprep.subr.bf16.mxu1 %v3384_v18  ;;  %v203_v44 = vrot.slane %v3800_v43, %v3795_v42  ;;  %v129_v18 = vsel %vm126_vm2, 1, %v3636_v19 }
  0x42   :  { %266 = vmatpush1.bf16.msra.mxu1 %v3386_v20  ;;  %v117_v20 = vshra.s32 %v113_v16, 3 }
  0x43   :  { %267 = vmatprep.subr.bf16.mxu1 %v3387_v21  ;;  %v118_v21 = vshra.s32 %v115_v17, 3 }
  0x45   :  { %vm123_vm3 = vcmp.eq.s32.totalorder %v117_v20, %v118_v21 }
  0x46   :  { %268 = vmatpush1.bf16.msra.mxu1 %v3389_v22  ;;  %v120_v22 = vand.u32 7, %v113_v16 }
  0xc2   :  { %v148_v4 = vpop.xlane.xlu0 %147 }
  0xc3   :  { %v153_v5 = vmul.f32 0.015625, %v148_v4 }
  0xc5   :  { %v155_v6 = vsub.f32 %v3750_v0, %v153_v5 }
  0xc6   :  { %v151_v7 = vpop.xlane.xlu0 %150 }
  0xc7   :  { %v154_v8 = vmul.f32 0.015625, %v151_v7  ;;  %v157_v9 = vmul.f32 %v155_v6, %v155_v6  ;;  %v207_v7 = vrot.slane %v3800_v43, %v206_v3 }
  0xc9   :  { %v156_v10 = vsub.f32 %v3752_v1, %v154_v8  ;;  %v159_v11 = vsel %vm145_vm0, %v157_v9, 0.0 }
  0xca   :  { %160 = vadd.xlane.f32.xlu1 %v159_v11 }
  0xcb   :  { %v158_v12 = vmul.f32 %v156_v10, %v156_v10 }
  0xcd   :  { %v162_v13 = vsel %vm145_vm0, %v158_v12, 0.0 }
  0xce   :  { %163 = vadd.xlane.f32.xlu1 %v162_v13 }
 0x153   :  { %v161_v23 = vpop.xlane.xlu1 %160 }
 0x154   :  { %v165_v24 = vmul.f32 0.015625, %v161_v23  ;;  %v121_v23 = vand.u32 7, %v115_v17 }
 0x156   :  { %v167_v25 = vadd.f32 1e-05, %v165_v24  ;;  %v116_v24 = vshra.s32 %v3792_v41, 3  ;;  %vm125_vm4 = vcmp.le.s32.totalorder %v121_v23, %v120_v22 }
 0x157   :  { %v164_v26 = vpop.xlane.xlu1 %163  ;;  %vm128_vm7 = vmand %vm123_vm3, %vm125_vm4 }
 0x158   :  { %3434 = vrsqrt.f32 %v167_v25  ;;  %v166_v27 = vmul.f32 0.015625, %v164_v26  ;;  %v119_v25 = vand.u32 7, %v3792_v41  ;;  %v133_v26 = vrot.slane %v129_v18, %v3795_v42 }
 0x159   :  { %vm122_vm5 = vcmp.eq.s32.totalorder %v116_v24, %v118_v21 }
 0x15a   :  { %v168_v28 = vadd.f32 1e-05, %v166_v27  ;;  %vm124_vm6 = vcmp.le.s32.totalorder %v121_v23, %v119_v25  ;;  %vm134_vm8 = vcmp.eq.s32.totalorder %v133_v26, 1  ;;  %v3640_v27 = vmov -1e+09  }
 0x15b   :  { %vm127_vm9 = vmand %vm122_vm5, %vm124_vm6 }
 0x15c   :  { %3436 = vrsqrt.f32 %v168_v28  ;;  %vm136_vm10 = vmand %vm128_vm7, %vm134_vm8 }
 0x15d   :  { %vm135_vm11 = vmand %vm127_vm9, %vm134_vm8  ;;  %v138_v28 = vsel %vm136_vm10, 0.0, %v3640_v27 }
 0x165   :  { %v3435_v29 = vpop.eup %3434 }
 0x166   :  { %v171_v30 = vmul.f32 %v3435_v29, %v155_v6  ;;  %v140_v29 = vsel %vm123_vm3, 0.0, %v3640_v27 }
 0x168   :  { %v179_v34 = vmul.f32 %v2869_v31, %v171_v30  ;;  %v137_v30 = vsel %vm135_vm11, 0.0, %v3640_v27 }
 0x169   :  { %v3437_v32 = vpop.eup %3436 }
 0x16a   :  { %v172_v33 = vmul.f32 %v3437_v32, %v156_v10  ;;  %v187_v37 = vadd.f32 %v2870_v35, %v179_v34  ;;  %v3869_v32 = vadd.f32 %v140_v29, %v138_v28 }
 0x16c   :  { %v180_v36 = vmul.f32 %v2869_v31, %v172_v33  ;;  %v139_v31 = vsel %vm122_vm5, 0.0, %v3640_v27 }
 0x16d   :  { %v3871_v33 = vadd.f32 %v139_v31, %v137_v30 }
 0x16e   :  { %v188_v38 = vadd.f32 %v2870_v35, %v180_v36 }
 0x170   :  { %v189_v39 = vpack.c.bf16 %v188_v38, %v187_v37 }
 0x172   :  { %2879 = vmatmul.mubr.msk.bf16.vlgmr.msra.gmra.mxu1 %vm145_vm0, %v189_v39 }
 0x232   :  { %v287_v45 = vpop.f32.mrf.mxu1 }
 0x233   :  { %v288_v46 = vadd.f32 %v287_v45, %v203_v44 }
 0x234   :  { %v3804_v47 = vpop.f32.mrf.mxu1 }
 0x235   :  { %314 = vrot.lane.b32.xlu1 %v288_v46, %s3637_s25  ;;  %v296_v48 = vmul.f32 0.25, %v288_v46  ;;  %v3854_v12 = vadd.f32 %v3804_v47, %v207_v7 }
 0x236   :  { %v291_v49 = vpop.f32.mrf.mxu1 }
 0x237   :  { %v292_v50 = vadd.f32 %v291_v49, %v203_v44  ;;  %3132 = vmatprep.mubr.msk.f32.mxu1 %vm350_vm1, %v296_v48 }
 0x238   :  { %v293_v6 = vpop.f32.mrf.mxu1 }
 0x239   :  { %316 = vrot.lane.b32.xlu0 %v292_v50, %s3637_s25  ;;  %320 = vrot.lane.b32.xlu1 %v292_v50, %s3638_s26  ;;  %v297_v51 = vmul.f32 0.25, %v292_v50  ;;  %v3844_v9 = vadd.f32 %v293_v6, %v207_v7 }
 0x23d   :  { %318 = vrot.lane.b32.xlu0 %v288_v46, %s3638_s26  ;;  %324 = vrot.lane.b32.xlu1 %v292_v50, %s3639_s27 }
 0x241   :  { %348 = vrot.lane.b32.xlu0 %v292_v50, %s3634_s29  ;;  %322 = vrot.lane.b32.xlu1 %v288_v46, %s3639_s27 }
 0x245   :  { %346 = vrot.lane.b32.xlu1 %v288_v46, %s3634_s29 }
 0x249   :  { %300 = vrot.lane.b32.xlu1 %v296_v48, %s3637_s25 }
 0x24d   :  { %302 = vrot.lane.b32.xlu1 %v297_v51, %s3637_s25 }
 0x2a7   :  { %v315_v52 = vpop.permute.xlu1 %314 }
 0x2a8   :  { %434 = vrot.lane.b32.xlu1 %v315_v52, %s3634_s29 }
 0x2ab   :  { %v317_v53 = vpop.permute.xlu0 %316  ;;  %v321_v54 = vpop.permute.xlu1 %320 }
 0x2af   :  { %v319_v55 = vpop.permute.xlu0 %318  ;;  %v325_v56 = vpop.permute.xlu1 %324 }
 0x2b0   :  { %521 = vrot.lane.b32.xlu0 %v319_v55, %s3634_s29 }
 0x2b3   :  { %v349_v57 = vpop.permute.xlu0 %348  ;;  %v323_v58 = vpop.permute.xlu1 %322 }
 0x2b4   :  { %436 = vrot.lane.b32.xlu0 %v317_v53, %s3634_s29  ;;  %3128 = vmatprep.subr.msk.mxu1 %vm350_vm1, %v349_v57 }
 0x2b5   :  { %608 = vrot.lane.b32.xlu1 %v323_v58, %s3634_s29  ;;  %3129 = vmatpush3.xpose.msk.msra.mxu1 %vm350_vm1, %v349_v57 }
 0x2b7   :  { %v347_v59 = vpop.permute.xlu1 %346 }
 0x2b8   :  { %523 = vrot.lane.b32.xlu0 %v321_v54, %s3634_s29  ;;  %3130 = vmatprep.subr.msk.mxu1 %vm350_vm1, %v347_v59 }
 0x2b9   :  { %306 = vrot.lane.b32.xlu1 %v297_v51, %s3638_s26  ;;  %3131 = vmatpush3.xpose.msk.msra.mxu1 %vm350_vm1, %v347_v59 }
 0x2bb   :  { %v301_v60 = vpop.permute.xlu1 %300 }
 0x2bc   :  { %610 = vrot.lane.b32.xlu0 %v325_v56, %s3634_s29  ;;  %3133 = vmatmul.mubr.msk.f32.vlgmr.msra.gmra.mxu1 %vm350_vm1, %v297_v51 }
 0x2bd   :  { %310 = vrot.lane.b32.xlu1 %v297_v51, %s3639_s27  ;;  %3139 = vmatprep.mubr.msk.f32.mxu1 %vm350_vm1, %v301_v60 }
 0x2bf   :  { %v303_v62 = vpop.permute.xlu1 %302 }
 0x2c0   :  { %304 = vrot.lane.b32.xlu0 %v296_v48, %s3638_s26 }
 0x2c4   :  { %308 = vrot.lane.b32.xlu0 %v296_v48, %s3639_s27 }
 0x31a   :  { %v435_v2 = vpop.permute.xlu1 %434 }
 0x322   :  { %v522_v61 = vpop.permute.xlu0 %521 }
 0x326   :  { %v437_v63 = vpop.permute.xlu0 %436 }
 0x327   :  { %3135 = vmatprep.subr.msk.mxu1 %vm350_vm1, %v437_v63  ;;  %v609_v5 = vpop.permute.xlu1 %608 }
 0x328   :  { %3136 = vmatpush3.xpose.msk.msra.mxu1 %vm350_vm1, %v437_v63 }
 0x329   :  { %3137 = vmatprep.subr.msk.mxu1 %vm350_vm1, %v435_v2 }
 0x32a   :  { %v524_v4 = vpop.permute.xlu0 %523 }
 0x32b   :  { %3142 = vmatprep.subr.msk.mxu0 %vm350_vm1, %v524_v4  ;;  %v307_v10 = vpop.permute.xlu1 %306 }
 0x32c   :  { %3138 = vmatpush3.xpose.msk.msra.mxu1 %vm350_vm1, %v435_v2  ;;  %3143 = vmatpush3.xpose.msk.msra.mxu0 %vm350_vm1, %v524_v4 }
 0x32d   :  { %3144 = vmatprep.subr.msk.mxu0 %vm350_vm1, %v522_v61 }
 0x32e   :  { %v611_v8 = vpop.permute.xlu0 %610 }
 0x32f   :  { %3140 = vmatmul.mubr.msk.f32.vlgmr.msra.gmra.mxu1 %vm350_vm1, %v303_v62  ;;  %3149 = vmatprep.subr.msk.mxu1 %vm350_vm1, %v611_v8  ;;  %v311_v14 = vpop.permute.xlu1 %310 }
 0x330   :  { %3145 = vmatpush3.xpose.msk.msra.mxu0 %vm350_vm1, %v522_v61  ;;  %3150 = vmatpush3.xpose.msk.msra.mxu1 %vm350_vm1, %v611_v8 }
 0x331   :  { %3151 = vmatprep.subr.msk.mxu1 %vm350_vm1, %v609_v5  ;;  %3156 = vmatprep.subr.mxu0 %v3844_v9 }
 0x332   :  { %v305_v11 = vpop.permute.xlu0 %304 }
 0x333   :  { %3146 = vmatprep.mubr.msk.f32.mxu0 %vm350_vm1, %v305_v11 }
 0x334   :  { %3147 = vmatmul.mubr.msk.f32.vlgmr.msra.gmra.mxu0 %vm350_vm1, %v307_v10  ;;  %3152 = vmatpush3.xpose.msk.msra.mxu1 %vm350_vm1, %v609_v5 }
 0x335   :  { %3157 = vmatpush3.msra.mxu0 %v3844_v9 }
 0x336   :  { %3158 = vmatprep.subr.mxu0 %v3854_v12  ;;  %v309_v13 = vpop.permute.xlu0 %308 }
 0x337   :  { %3159 = vmatpush3.msra.mxu0 %v3854_v12  ;;  %3153 = vmatprep.mubr.msk.f32.mxu1 %vm350_vm1, %v309_v13 }
 0x338   :  { %3154 = vmatmul.mubr.msk.f32.vlgmr.msra.gmra.mxu1 %vm350_vm1, %v311_v14 }
 0x37c   :  { %v3134_v34 = vpop.f32.mrf.mxu1 }
 0x37d   :  { %v431_v35 = vadd.f32 %v3134_v34, %v3869_v32 }
 0x37e   :  { %v425_v36 = vpop.f32.mrf.mxu1 }
 0x37f   :  { %v426_v37 = vadd.f32 %v425_v36, %v3871_v33  ;;  %v698_v38 = vsel %vm350_vm1, %v431_v35, -inf }
 0x380   :  { %699 = vmax.xlane.f32.xlu1 %v698_v38 }
 0x381   :  { %v695_v39 = vsel %vm350_vm1, %v426_v37, -inf }
 0x382   :  { %696 = vmax.xlane.f32.xlu0 %v695_v39 }
 0x3ef   :  { %v3141_v40 = vpop.f32.mrf.mxu1 }
 0x3f0   :  { %v518_v43 = vadd.f32 %v3141_v40, %v3869_v32 }
 0x3f1   :  { %v512_v44 = vpop.f32.mrf.mxu1 }
 0x3f2   :  { %v513_v45 = vadd.f32 %v512_v44, %v3871_v33  ;;  %v704_v46 = vsel %vm350_vm1, %v518_v43, -inf }
 0x3f3   :  { %705 = vmax.xlane.f32.xlu0 %v704_v46 }
 0x3f4   :  { %v3148_v47 = vpop.f32.mrf.mxu0  ;;  %v701_v50 = vsel %vm350_vm1, %v513_v45, -inf }
 0x3f5   :  { %v605_v48 = vadd.f32 %v3148_v47, %v3869_v32 }
 0x3f6   :  { %v599_v49 = vpop.f32.mrf.mxu0 }
 0x3f7   :  { %v600_v51 = vadd.f32 %v599_v49, %v3871_v33  ;;  %702 = vmax.xlane.f32.xlu0 %v701_v50  ;;  %v710_v52 = vsel %vm350_vm1, %v605_v48, -inf }
 0x3f8   :  { %711 = vmax.xlane.f32.xlu1 %v710_v52  ;;  %v3155_v53 = vpop.f32.mrf.mxu1 }
 0x3f9   :  { %v692_v54 = vadd.f32 %v3155_v53, %v3869_v32  ;;  %v707_v55 = vsel %vm350_vm1, %v600_v51, -inf }
 0x3fa   :  { %v686_v56 = vpop.f32.mrf.mxu1 }
 0x3fb   :  { %v687_v57 = vadd.f32 %v686_v56, %v3871_v33  ;;  %708 = vmax.xlane.f32.xlu0 %v707_v55  ;;  %v716_v58 = vsel %vm350_vm1, %v692_v54, -inf }
 0x3fc   :  { %717 = vmax.xlane.f32.xlu1 %v716_v58 }
 0x3fd   :  { %v713_v59 = vsel %vm350_vm1, %v687_v57, -inf }
 0x3ff   :  { %714 = vmax.xlane.f32.xlu0 %v713_v59 }
 0x409   :  { %v700_v62 = vpop.xlane.xlu1 %699 }
 0x40a   :  { %v720_v2 = vsub.f32 %v431_v35, %v700_v62 }
 0x40b   :  { %v697_v60 = vpop.xlane.xlu0 %696 }
 0x40c   :  { %v719_v61 = vsub.f32 %v426_v37, %v697_v60  ;;  %v729_v4 = vmul.f32 1.442695, %v720_v2 }
 0x40d   :  { %328 = vrot.lane.b32.xlu1 %v3854_v12, %s3637_s25 }
 0x40e   :  { %v727_v63 = vmul.f32 1.442695, %v719_v61 }
 0x410   :  { %3438 = vpow2.f32 %v727_v63 }
 0x411   :  { %336 = vrot.lane.b32.xlu1 %v3844_v9, %s3638_s26  ;;  %3440 = vpow2.f32 %v729_v4 }
 0x415   :  { %342 = vrot.lane.b32.xlu1 %v3844_v9, %s3639_s27  ;;  %330 = vrot.lane.b32.xlu0 %v3844_v9, %s3637_s25 }
 0x41d   :  { %v3897_v5 = vpop.eup %3438 }
 0x41e   :  { %v743_v6 = vsel %vm350_vm1, %v3897_v5, 0.0  ;;  %v3901_v7 = vpop.eup %3440 }
 0x41f   :  { %v746_v8 = vsel %vm350_vm1, %v3901_v7, 0.0 }
 0x434   :  { %744 = vadd.xlane.f32.xlu0 %v743_v6 }
 0x439   :  { %747 = vadd.xlane.f32.xlu1 %v746_v8 }
 0x47c   :  { %v706_v9 = vpop.xlane.xlu0 %705 }
 0x47d   :  { %v722_v10 = vsub.f32 %v518_v43, %v706_v9 }
 0x47f   :  { %v733_v11 = vmul.f32 1.442695, %v722_v10 }
 0x480   :  { %v703_v13 = vpop.xlane.xlu0 %702 }
 0x481   :  { %3442 = vpow2.f32 %v733_v11  ;;  %v721_v14 = vsub.f32 %v513_v45, %v703_v13  ;;  %v712_v15 = vpop.xlane.xlu1 %711 }
 0x482   :  { %v724_v16 = vsub.f32 %v605_v48, %v712_v15  ;;  %v3641_v15 = vmov 0.0  }
 0x483   :  { %v731_v17 = vmul.f32 1.442695, %v721_v14  ;;  %v3390_v14 = vld [vmem:[%s4296_s6 + $0x18] sm:$0xff]  }
 0x484   :  { %v737_v18 = vmul.f32 1.442695, %v724_v16  ;;  %v709_v20 = vpop.xlane.xlu0 %708  ;;  %v3391_v16 = vld [vmem:[%s4296_s6 + $0x10] sm:$0xff]  }
 0x485   :  { %3444 = vpow2.f32 %v731_v17  ;;  %v723_v21 = vsub.f32 %v600_v51, %v709_v20  ;;  %v718_v22 = vpop.xlane.xlu1 %717  ;;  %v3392_v17 = vld [vmem:[%s4296_s6 + $0x8] sm:$0xff]  }
 0x486   :  { %3446 = vpow2.f32 %v737_v18  ;;  %v726_v23 = vsub.f32 %v692_v54, %v718_v22 }
 0x487   :  { %v735_v24 = vmul.f32 1.442695, %v723_v21  ;;  %v3393_v21 = vld [vmem:[%s4296_s6] sm:$0xff]  }
 0x488   :  { %v741_v25 = vmul.f32 1.442695, %v726_v23  ;;  %v715_v26 = vpop.xlane.xlu0 %714 }
 0x489   :  { %3448 = vpow2.f32 %v735_v24  ;;  %v725_v27 = vsub.f32 %v687_v57, %v715_v26  ;;  %v329_v28 = vpop.permute.xlu1 %328 }
 0x48a   :  { %3450 = vpow2.f32 %v741_v25 }
 0x48b   :  { %v739_v29 = vmul.f32 1.442695, %v725_v27 }
 0x48c   :  { %v331_v30 = vpop.permute.xlu0 %330 }
 0x48d   :  { %3452 = vpow2.f32 %v739_v29  ;;  %v337_v31 = vpop.permute.xlu1 %336  ;;  %3163 = vmatprep.subr.mxu1 %v331_v30 }
 0x48e   :  { %v3443_v34 = vpop.eup %3442  ;;  %3164 = vmatpush3.msra.mxu1 %v331_v30  ;;  %3170 = vmatprep.subr.mxu0 %v337_v31 }
 0x48f   :  { %3165 = vmatprep.subr.mxu1 %v329_v28  ;;  %v752_v35 = vsel %vm350_vm1, %v3443_v34, 0.0 }
 0x490   :  { %753 = vadd.xlane.f32.xlu1 %v752_v35  ;;  %3166 = vmatpush3.msra.mxu1 %v329_v28 }
 0x491   :  { %v343_v36 = vpop.permute.xlu1 %342 }
 0x492   :  { %v3445_v37 = vpop.eup %3444  ;;  %3177 = vmatprep.subr.mxu1 %v343_v36 }
 0x493   :  { %v3447_v38 = vpop.eup %3446  ;;  %v749_v39 = vsel %vm350_vm1, %v3445_v37, 0.0 }
 0x494   :  { %750 = vadd.xlane.f32.xlu0 %v749_v39  ;;  %v758_v40 = vsel %vm350_vm1, %v3447_v38, 0.0 }
 0x495   :  { %759 = vadd.xlane.f32.xlu1 %v758_v40 }
 0x496   :  { %v3449_v43 = vpop.eup %3448 }
 0x497   :  { %v3451_v44 = vpop.eup %3450  ;;  %v755_v45 = vsel %vm350_vm1, %v3449_v43, 0.0 }
 0x498   :  { %756 = vadd.xlane.f32.xlu0 %v755_v45  ;;  %v764_v46 = vsel %vm350_vm1, %v3451_v44, 0.0 }
 0x499   :  { %765 = vadd.xlane.f32.xlu1 %v764_v46 }
 0x49a   :  { %v3453_v47 = vpop.eup %3452 }
 0x49b   :  { %v761_v48 = vsel %vm350_vm1, %v3453_v47, 0.0 }
 0x49c   :  { %762 = vadd.xlane.f32.xlu0 %v761_v48 }
 0x4aa   :  { %340 = vrot.lane.b32.xlu1 %v3854_v12, %s3639_s27 }
 0x4b2   :  { %334 = vrot.lane.b32.xlu0 %v3854_v12, %s3638_s26 }
 0x4bd   :  { %v745_v49 = vpop.xlane.xlu0 %744 }
 0x4be   :  { %3454 = vrcp.f32 %v745_v49 }
 0x4c2   :  { %v748_v50 = vpop.xlane.xlu1 %747 }
 0x4c3   :  { %3456 = vrcp.f32 %v748_v50 }
 0x4cb   :  { %v3455_v51 = vpop.eup %3454 }
 0x4cc   :  { %v775_v52 = vmul.f32 %v3455_v51, %v3897_v5  ;;  %v2904_v51 = vld [vmem:[%s4297_s7] ss:$0 sm:$0xff] }
 0x4ce   :  { %3160 = vmatprep.mubr.msk.f32.mxu0 %vm350_vm1, %v775_v52 }
 0x4d0   :  { %v3457_v53 = vpop.eup %3456 }
 0x4d1   :  { %v776_v54 = vmul.f32 %v3457_v53, %v3901_v7 }
 0x4d3   :  { %3161 = vmatmul.mubr.msk.f32.vlgmr.msra.gmra.mxu0 %vm350_vm1, %v776_v54 }
 0x4d4   :  { %3171 = vmatpush3.msra.mxu0 %v337_v31 }
 0x519   :  { %v754_v55 = vpop.xlane.xlu1 %753 }
 0x51a   :  { %3458 = vrcp.f32 %v754_v55 }
 0x51d   :  { %v751_v56 = vpop.xlane.xlu0 %750 }
 0x51e   :  { %3460 = vrcp.f32 %v751_v56  ;;  %v760_v12 = vpop.xlane.xlu1 %759 }
 0x51f   :  { %3462 = vrcp.f32 %v760_v12 }
 0x521   :  { %v757_v57 = vpop.xlane.xlu0 %756 }
 0x522   :  { %3464 = vrcp.f32 %v757_v57  ;;  %v766_v58 = vpop.xlane.xlu1 %765 }
 0x523   :  { %3466 = vrcp.f32 %v766_v58 }
 0x525   :  { %v763_v59 = vpop.xlane.xlu0 %762 }
 0x526   :  { %3468 = vrcp.f32 %v763_v59  ;;  %v341_v6 = vpop.permute.xlu1 %340 }
 0x527   :  { %v3459_v61 = vpop.eup %3458 }
 0x528   :  { %v778_v2 = vmul.f32 %v3459_v61, %v3443_v34 }
 0x529   :  { %v335_v60 = vpop.permute.xlu0 %334 }
 0x52a   :  { %3172 = vmatprep.subr.mxu0 %v335_v60 }
 0x52b   :  { %v3461_v62 = vpop.eup %3460  ;;  %3173 = vmatpush3.msra.mxu0 %v335_v60 }
 0x52c   :  { %v777_v63 = vmul.f32 %v3461_v62, %v3445_v37  ;;  %v3463_v4 = vpop.eup %3462  ;;  %3184 = vmatprep.subr.bf16.mxu0 %v3641_v15 }
 0x52d   :  { %v780_v8 = vmul.f32 %v3463_v4, %v3447_v38 }
 0x52e   :  { %3167 = vmatprep.mubr.msk.f32.mxu1 %vm350_vm1, %v777_v63 }
 0x52f   :  { %v3465_v5 = vpop.eup %3464  ;;  %3168 = vmatmul.mubr.msk.f32.vlgmr.msra.gmra.mxu1 %vm350_vm1, %v778_v2 }
 0x530   :  { %3178 = vmatpush3.msra.mxu1 %v343_v36  ;;  %v779_v7 = vmul.f32 %v3465_v5, %v3449_v43  ;;  %v3467_v9 = vpop.eup %3466 }
 0x531   :  { %3179 = vmatprep.subr.mxu1 %v341_v6  ;;  %v782_v13 = vmul.f32 %v3467_v9, %v3451_v44  ;;  %v3395_v9 = vld [vmem:[#allocation8 + $0x10] sm:$0xff]  }
 0x532   :  { %3180 = vmatpush3.msra.mxu1 %v341_v6  ;;  %3174 = vmatprep.mubr.msk.f32.mxu0 %vm350_vm1, %v779_v7 }
 0x533   :  { %v3469_v10 = vpop.eup %3468  ;;  %3175 = vmatmul.mubr.msk.f32.vlgmr.msra.gmra.mxu0 %vm350_vm1, %v780_v8  ;;  %3196 = vmatprep.subr.bf16.mxu1 %v3641_v15  ;;  %v3394_v8 = vld [vmem:[#allocation8 + $0x18] sm:$0xff]  }
 0x534   :  { %v781_v11 = vmul.f32 %v3469_v10, %v3453_v47  ;;  %3185 = vmatpush3.bf16.msra.mxu0 %v3390_v14  ;;  %3192 = vmatprep.mubr.msk.bf16.mxu0 %vm3642_vm12, %v3641_v15  ;;  %v3396_v10 = vld [vmem:[#allocation8 + $0x8] sm:$0xff]   ;;  %v3399_v14 = vld [vmem:[%s4302_s12 + $0x30] sm:$0xff]  }
 0x535   :  { %3186 = vmatprep.subr.bf16.mxu0 %v3641_v15 }
 0x536   :  { %3181 = vmatprep.mubr.msk.f32.mxu1 %vm350_vm1, %v781_v11  ;;  %v3397_v11 = vld [vmem:[#allocation8] sm:$0xff]  }
 0x537   :  { %3182 = vmatmul.mubr.msk.f32.vlgmr.msra.gmra.mxu1 %vm350_vm1, %v782_v13  ;;  %v3398_v13 = vld [vmem:[%s4302_s12 + $0x38] sm:$0xff]  }
 0x538   :  { %3187 = vmatpush3.bf16.msra.mxu0 %v3391_v16  ;;  %3204 = vmatprep.mubr.msk.bf16.mxu1 %vm3642_vm12, %v3641_v15  ;;  %v3400_v16 = vld [vmem:[%s4302_s12 + $0x28] sm:$0xff]  }
 0x539   :  { %3188 = vmatprep.subr.bf16.mxu0 %v3641_v15  ;;  %3197 = vmatpush3.bf16.msra.mxu1 %v3394_v8 }
 0x53a   :  { %3198 = vmatprep.subr.bf16.mxu1 %v3641_v15 }
 0x53c   :  { %3189 = vmatpush3.bf16.msra.mxu0 %v3392_v17  ;;  %v3401_v17 = vld [vmem:[%s4302_s12 + $0x20] sm:$0xff]  }
 0x53d   :  { %3190 = vmatprep.subr.bf16.mxu0 %v3641_v15  ;;  %3199 = vmatpush3.bf16.msra.mxu1 %v3395_v9 }
 0x53e   :  { %3200 = vmatprep.subr.bf16.mxu1 %v3641_v15 }
 0x540   :  { %3191 = vmatpush3.bf16.msra.mxu0 %v3393_v21 }
 0x541   :  { %3208 = vmatprep.subr.bf16.mxu0 %v3641_v15  ;;  %3201 = vmatpush3.bf16.msra.mxu1 %v3396_v10  ;;  %v3408_v10 = vld [vmem:[%s4294_s4 + $0x74] ss:$8 sps:$4 sm:$0xff]  }
 0x542   :  { %3202 = vmatprep.subr.bf16.mxu1 %v3641_v15 }
 0x545   :  { %3203 = vmatpush3.bf16.msra.mxu1 %v3397_v11  ;;  %v3406_v11 = vld [vmem:[%s4294_s4 + $0x70] ss:$8 sps:$4 sm:$0xff]  }
 0x546   :  { %1590 = vmatprep.subr.bf16.mxu1 %v3408_v10 }
 0x593   :  { %v3162_v18 = vpop.f32.mrf.mxu0 }
 0x595   :  { %v855_v22 = vpop.f32.mrf.mxu0 }
 0x5ef   :  { %v3169_v20 = vpop.f32.mrf.mxu1 }
 0x5f1   :  { %v936_v23 = vpop.f32.mrf.mxu1 }
 0x5f2   :  { %v3348_v24 = vpack.i.bf16 %v3169_v20, %v936_v23 }
 0x5f3   :  { %v3176_v25 = vpop.f32.mrf.mxu0 }
 0x5f4   :  { %3349 = vrot.lane.b32.xlu0 %v3348_v24, %s3631_s22 }
 0x5f5   :  { %v1017_v26 = vpop.f32.mrf.mxu0 }
 0x5f6   :  { %v3353_v27 = vpack.i.bf16 %v3176_v25, %v1017_v26 }
 0x5f7   :  { %v3183_v28 = vpop.f32.mrf.mxu1 }
 0x5f8   :  { %3354 = vrot.lane.b32.xlu1 %v3353_v27, %s3643_s21 }
 0x5f9   :  { %v1098_v29 = vpop.f32.mrf.mxu1 }
 0x5fa   :  { %v3358_v30 = vpack.i.bf16 %v3183_v28, %v1098_v29  ;;  %v2910_v28 = vld [vmem:[%s4298_s8] ss:$0 sm:$0xff] }
 0x5fc   :  { %3359 = vrot.lane.b32.xlu0 %v3358_v30, %s3644_s1 }
 0x666   :  { %v3350_v31 = vpop.permute.xlu0 %3349 }
 0x667   :  { %v3352_v35 = vunpack.i.h.bf16 %v3350_v31  ;;  %v3351_v36 = vunpack.i.l.bf16 %v3350_v31 }
 0x669   :  { %v1132_v40 = vsel %vm350_vm1, %v3162_v18, %v3352_v35  ;;  %v1131_v43 = vsel %vm350_vm1, %v855_v22, %v3351_v36  ;;  %v3402_v18 = vld [vmem:[%s4302_s12 + $0x18] sm:$0xff]  }
 0x66a   :  { %v3355_v34 = vpop.permute.xlu1 %3354 }
 0x66b   :  { %v3357_v37 = vunpack.i.h.bf16 %v3355_v34  ;;  %v3356_v38 = vunpack.i.l.bf16 %v3355_v34  ;;  %v2911_v34 = vld [vmem:[%s4299_s9] ss:$0 sm:$0xff] }
 0x66d   :  { %v1134_v46 = vsel %vm1133_vm13, %v1131_v43, %v3356_v38  ;;  %v1135_v47 = vsel %vm1133_vm13, %v1132_v40, %v3357_v37  ;;  %v3404_v40 = vld [vmem:[%s4302_s12 + $0x8] sm:$0xff]   ;;  %v3405_v43 = vld [vmem:[%s4302_s12] sm:$0xff]  }
 0x66e   :  { %v3360_v39 = vpop.permute.xlu0 %3359 }
 0x66f   :  { %v3362_v44 = vunpack.i.h.bf16 %v3360_v39  ;;  %v3361_v45 = vunpack.i.l.bf16 %v3360_v39  ;;  %v3403_v39 = vld [vmem:[%s4302_s12 + $0x10] sm:$0xff]  }
 0x671   :  { %v1137_v48 = vsel %vm1136_vm14, %v1134_v46, %v3361_v45  ;;  %v1138_v49 = vsel %vm1136_vm14, %v1135_v47, %v3362_v44 }
 0x672   :  { %v1139_v50 = vpack.c.bf16 %v1138_v49, %v1137_v48 }
 0x674   :  { %3193 = vmatmul.mubr.msk.bf16.vlgmr.msra.gmra.mxu0 %vm145_vm0, %v1139_v50 }
 0x675   :  { %3224 = vmatprep.mubr.msk.bf16.mxu0 %vm3642_vm12, %v3641_v15  ;;  %3209 = vmatpush3.bf16.msra.mxu0 %v3398_v13  ;;  %v3411_v13 = vld [vmem:[%s4294_s4 + $0x64] ss:$8 sps:$4 sm:$0xff]  }
 0x676   :  { %3210 = vmatprep.subr.bf16.mxu0 %v3641_v15 }
 0x679   :  { %3211 = vmatpush3.bf16.msra.mxu0 %v3399_v14  ;;  %v3409_v14 = vld [vmem:[%s4294_s4 + $0x60] ss:$8 sps:$4 sm:$0xff]  }
 0x67a   :  { %3212 = vmatprep.subr.bf16.mxu0 %v3641_v15 }
 0x67d   :  { %3213 = vmatpush3.bf16.msra.mxu0 %v3400_v16  ;;  %v3414_v16 = vld [vmem:[%s4294_s4 + $0x54] ss:$8 sps:$4 sm:$0xff]  }
 0x67e   :  { %3214 = vmatprep.subr.bf16.mxu0 %v3641_v15 }
 0x681   :  { %3215 = vmatpush3.bf16.msra.mxu0 %v3401_v17  ;;  %v3412_v17 = vld [vmem:[%s4294_s4 + $0x50] ss:$8 sps:$4 sm:$0xff]  }
 0x682   :  { %3216 = vmatprep.subr.bf16.mxu0 %v3641_v15 }
 0x685   :  { %3217 = vmatpush3.bf16.msra.mxu0 %v3402_v18  ;;  %v3417_v18 = vld [vmem:[%s4294_s4 + $0x44] ss:$8 sps:$4 sm:$0xff]  }
 0x686   :  { %3218 = vmatprep.subr.bf16.mxu0 %v3641_v15 }
 0x689   :  { %3219 = vmatpush3.bf16.msra.mxu0 %v3403_v39 }
 0x68a   :  { %3220 = vmatprep.subr.bf16.mxu0 %v3641_v15 }
 0x68d   :  { %3221 = vmatpush3.bf16.msra.mxu0 %v3404_v40  ;;  %v2938_v40 = vld [vmem:[%s4295_s5 + $0x2] sm:$0x3] }
 0x68e   :  { %3222 = vmatprep.subr.bf16.mxu0 %v3641_v15 }
 0x691   :  { %3223 = vmatpush3.bf16.msra.mxu0 %v3405_v43  ;;  %v1532_v43 = vrot.slane %v2938_v40, %v3795_v42 }
 0x734   :  { %v1216_v52 = vpop.f32.mrf.mxu0 }
 0x735   :  { %v1217_v53 = vadd.f32 %v2904_v51, %v1216_v52 }
 0x736   :  { %v3194_v54 = vpop.f32.mrf.mxu0 }
 0x737   :  { %v3963_v55 = vadd.f32 %v1217_v53, %v3750_v0  ;;  %v2918_v53 = vld [vmem:[%s4303_s13] ss:$0 sm:$0xff] }
 0x738   :  { %v1219_v56 = vpop.f32.mrf.mxu0 }
 0x739   :  { %v1220_v12 = vadd.f32 %v2904_v51, %v1219_v56  ;;  %v1227_v57 = vsel %vm145_vm0, %v3963_v55, 0.0 }
 0x73a   :  { %1228 = vadd.xlane.f32.xlu1 %v1227_v57  ;;  %v3195_v58 = vpop.f32.mrf.mxu0 }
 0x73b   :  { %v3968_v59 = vadd.f32 %v1220_v12, %v3752_v1 }
 0x73d   :  { %v1230_v60 = vsel %vm145_vm0, %v3968_v59, 0.0 }
 0x73e   :  { %1231 = vadd.xlane.f32.xlu0 %v1230_v60 }
 0x7c3   :  { %v1229_v61 = vpop.xlane.xlu1 %1228 }
 0x7c4   :  { %v1233_v62 = vmul.f32 0.015625, %v1229_v61 }
 0x7c6   :  { %v1235_v63 = vsub.f32 %v3963_v55, %v1233_v62 }
 0x7c7   :  { %v1232_v0 = vpop.xlane.xlu0 %1231 }
 0x7c8   :  { %v1234_v2 = vmul.f32 0.015625, %v1232_v0  ;;  %v1237_v4 = vmul.f32 %v1235_v63, %v1235_v63 }
 0x7ca   :  { %v1236_v5 = vsub.f32 %v3968_v59, %v1234_v2  ;;  %v1239_v6 = vsel %vm145_vm0, %v1237_v4, 0.0 }
 0x7cb   :  { %1240 = vadd.xlane.f32.xlu0 %v1239_v6 }
 0x7cc   :  { %v1238_v7 = vmul.f32 %v1236_v5, %v1236_v5 }
 0x7ce   :  { %v1242_v1 = vsel %vm145_vm0, %v1238_v7, 0.0 }
 0x7cf   :  { %1243 = vadd.xlane.f32.xlu0 %v1242_v1 }
 0x854   :  { %v1241_v20 = vpop.xlane.xlu0 %1240 }
 0x855   :  { %v1245_v21 = vmul.f32 0.015625, %v1241_v20  ;;  %v3415_v20 = vld [vmem:[%s4294_s4 + $0x40] ss:$8 sps:$4 sm:$0xff]  }
 0x857   :  { %v1247_v22 = vadd.f32 1e-05, %v1245_v21 }
 0x858   :  { %v1244_v23 = vpop.xlane.xlu0 %1243 }
 0x859   :  { %3470 = vrsqrt.f32 %v1247_v22  ;;  %v1246_v24 = vmul.f32 0.015625, %v1244_v23 }
 0x85b   :  { %v1248_v25 = vadd.f32 1e-05, %v1246_v24 }
 0x85d   :  { %3472 = vrsqrt.f32 %v1248_v25 }
 0x866   :  { %v3471_v26 = vpop.eup %3470 }
 0x867   :  { %v1251_v27 = vmul.f32 %v3471_v26, %v1235_v63 }
 0x869   :  { %v1259_v31 = vmul.f32 %v2910_v28, %v1251_v27 }
 0x86a   :  { %v3473_v29 = vpop.eup %3472 }
 0x86b   :  { %v1252_v30 = vmul.f32 %v3473_v29, %v1236_v5  ;;  %v1267_v36 = vadd.f32 %v2911_v34, %v1259_v31  ;;  %v2928_v29 = vld [vmem:[%s4292_s2 + $0x1] ss:$0 sm:$0xff] }
 0x86d   :  { %v1260_v35 = vmul.f32 %v2910_v28, %v1252_v30 }
 0x86f   :  { %v1268_v37 = vadd.f32 %v2911_v34, %v1260_v35  ;;  %v2929_v35 = vld [vmem:[#allocation7 + $0x1] ss:$0 sm:$0xff] }
 0x871   :  { %v1269_v38 = vpack.c.bf16 %v1268_v37, %v1267_v36 }
 0x873   :  { %3205 = vmatmul.mubr.msk.bf16.vlgmr.msra.gmra.mxu1 %vm145_vm0, %v1269_v38 }
 0x874   :  { %1614 = vmatprep.mubr.bf16.mxu1 %v3636_v19  ;;  %v2912_v19 = vld [vmem:[%s4301_s11] ss:$0 sm:$0xff]  ;;  %1591 = vmatpush1.bf16.msra.mxu1 %v3406_v11 }
 0x875   :  { %1592 = vmatprep.subr.bf16.mxu1 %v3411_v13 }
 0x878   :  { %1593 = vmatpush1.bf16.msra.mxu1 %v3409_v14 }
 0x879   :  { %1594 = vmatprep.subr.bf16.mxu1 %v3414_v16 }
 0x87c   :  { %1595 = vmatpush1.bf16.msra.mxu1 %v3412_v17 }
 0x87d   :  { %1596 = vmatprep.subr.bf16.mxu1 %v3417_v18 }
 0x880   :  { %1597 = vmatpush1.bf16.msra.mxu1 %v3415_v20 }
 0x933   :  { %v1346_v44 = vpop.f32.mrf.mxu1 }
 0x934   :  { %v1347_v46 = vadd.f32 %v2912_v19, %v1346_v44 }
 0x935   :  { %v3206_v45 = vpop.f32.mrf.mxu1 }
 0x936   :  { %v1353_v50 = vmax.f32 %v1347_v46, 0.0 }
 0x937   :  { %v1349_v47 = vpop.f32.mrf.mxu1 }
 0x938   :  { %v1350_v48 = vadd.f32 %v2912_v19, %v1349_v47 }
 0x939   :  { %v3207_v49 = vpop.f32.mrf.mxu1 }
 0x93a   :  { %v1354_v51 = vmax.f32 %v1350_v48, 0.0 }
 0x93c   :  { %v1355_v52 = vpack.c.bf16 %v1354_v51, %v1353_v50 }
 0x93e   :  { %3225 = vmatmul.mubr.bf16.vlgmr.msra.gmra.mxu0 %v1355_v52 }
 0x9fe   :  { %v1461_v54 = vpop.f32.mrf.mxu0 }
 0x9ff   :  { %v1462_v56 = vadd.f32 %v2918_v53, %v1461_v54 }
 0xa00   :  { %v3226_v12 = vpop.f32.mrf.mxu0 }
 0xa01   :  { %v4025_v57 = vadd.f32 %v1462_v56, %v3963_v55 }
 0xa02   :  { %v1464_v58 = vpop.f32.mrf.mxu0 }
 0xa03   :  { %v1465_v60 = vadd.f32 %v2918_v53, %v1464_v58  ;;  %v1474_v61 = vsel %vm145_vm0, %v4025_v57, 0.0 }
 0xa04   :  { %1475 = vadd.xlane.f32.xlu1 %v1474_v61  ;;  %v3227_v62 = vpop.f32.mrf.mxu0 }
 0xa05   :  { %v4030_v63 = vadd.f32 %v1465_v60, %v3968_v59 }
 0xa07   :  { %v1477_v0 = vsel %vm145_vm0, %v4030_v63, 0.0 }
 0xa08   :  { %1478 = vadd.xlane.f32.xlu0 %v1477_v0 }
 0xa8d   :  { %v1476_v2 = vpop.xlane.xlu1 %1475 }
 0xa8e   :  { %v1480_v4 = vmul.f32 0.015625, %v1476_v2 }
 0xa90   :  { %v1482_v5 = vsub.f32 %v4025_v57, %v1480_v4 }
 0xa91   :  { %v1479_v55 = vpop.xlane.xlu0 %1478 }
 0xa92   :  { %v1481_v6 = vmul.f32 0.015625, %v1479_v55  ;;  %v1484_v7 = vmul.f32 %v1482_v5, %v1482_v5  ;;  %v1536_v55 = vrot.slane %v2938_v40, %v206_v3 }
 0xa94   :  { %v1483_v1 = vsub.f32 %v4030_v63, %v1481_v6  ;;  %v1486_v8 = vsel %vm145_vm0, %v1484_v7, 0.0 }
 0xa95   :  { %1487 = vadd.xlane.f32.xlu1 %v1486_v8 }
 0xa96   :  { %v1485_v9 = vmul.f32 %v1483_v1, %v1483_v1 }
 0xa98   :  { %v1489_v59 = vsel %vm145_vm0, %v1485_v9, 0.0 }
 0xa99   :  { %1490 = vadd.xlane.f32.xlu0 %v1489_v59 }
 0xb1e   :  { %v1488_v21 = vpop.xlane.xlu1 %1487 }
 0xb1f   :  { %v1492_v22 = vmul.f32 0.015625, %v1488_v21 }
 0xb21   :  { %v1494_v23 = vadd.f32 1e-05, %v1492_v22 }
 0xb22   :  { %v1491_v24 = vpop.xlane.xlu0 %1490 }
 0xb23   :  { %3474 = vrsqrt.f32 %v1494_v23  ;;  %v1493_v25 = vmul.f32 0.015625, %v1491_v24 }
 0xb25   :  { %v1495_v26 = vadd.f32 1e-05, %v1493_v25 }
 0xb27   :  { %3476 = vrsqrt.f32 %v1495_v26 }
 0xb30   :  { %v3475_v27 = vpop.eup %3474 }
 0xb31   :  { %v1498_v28 = vmul.f32 %v3475_v27, %v1482_v5 }
 0xb33   :  { %v1506_v34 = vmul.f32 %v2928_v29, %v1498_v28 }
 0xb34   :  { %v3477_v30 = vpop.eup %3476 }
 0xb35   :  { %v1499_v31 = vmul.f32 %v3477_v30, %v1483_v1  ;;  %v1514_v37 = vadd.f32 %v2929_v35, %v1506_v34 }
 0xb37   :  { %v1507_v36 = vmul.f32 %v2928_v29, %v1499_v31 }
 0xb39   :  { %v1515_v38 = vadd.f32 %v2929_v35, %v1507_v36 }
 0xb3b   :  { %v1516_v39 = vpack.c.bf16 %v1515_v38, %v1514_v37 }
 0xb3d   :  { %2947 = vmatmul.mubr.msk.bf16.vlgmr.msra.gmra.mxu1 %vm145_vm0, %v1516_v39 }
 0xbfd   :  { %v1616_v19 = vpop.f32.mrf.mxu1 }
 0xbfe   :  { %v1617_v44 = vadd.f32 %v1616_v19, %v1532_v43 }
 0xbff   :  { %v4070_v45 = vpop.f32.mrf.mxu1 }
 0xc00   :  { %1643 = vrot.lane.b32.xlu0 %v1617_v44, %s3637_s25  ;;  %v1625_v46 = vmul.f32 0.25, %v1617_v44  ;;  %v4115_v41 = vadd.f32 %v4070_v45, %v1536_v55 }
 0xc01   :  { %v1620_v47 = vpop.f32.mrf.mxu1 }
 0xc02   :  { %v1621_v48 = vadd.f32 %v1620_v47, %v1532_v43  ;;  %3232 = vmatprep.mubr.msk.f32.mxu1 %vm350_vm1, %v1625_v46 }
 0xc03   :  { %v1622_v5 = vpop.f32.mrf.mxu1 }
 0xc04   :  { %1645 = vrot.lane.b32.xlu1 %v1621_v48, %s3637_s25  ;;  %1651 = vrot.lane.b32.xlu0 %v1617_v44, %s3639_s27  ;;  %v1626_v42 = vmul.f32 0.25, %v1621_v48  ;;  %v1623_v7 = vadd.f32 %v1622_v5, %v1536_v55 }
 0xc08   :  { %1649 = vrot.lane.b32.xlu1 %v1621_v48, %s3638_s26  ;;  %1675 = vrot.lane.b32.xlu0 %v1617_v44, %s3634_s29 }
 0xc0c   :  { %1653 = vrot.lane.b32.xlu1 %v1621_v48, %s3639_s27  ;;  %1629 = vrot.lane.b32.xlu0 %v1625_v46, %s3637_s25 }
 0xc10   :  { %1647 = vrot.lane.b32.xlu1 %v1617_v44, %s3638_s26  ;;  %1631 = vrot.lane.b32.xlu0 %v1626_v42, %s3637_s25 }
 0xc14   :  { %1677 = vrot.lane.b32.xlu1 %v1621_v48, %s3634_s29 }
 0xc72   :  { %v1644_v49 = vpop.permute.xlu0 %1643 }
 0xc73   :  { %1762 = vrot.lane.b32.xlu0 %v1644_v49, %s3634_s29 }
 0xc76   :  { %v1646_v50 = vpop.permute.xlu1 %1645  ;;  %v1652_v51 = vpop.permute.xlu0 %1651 }
 0xc77   :  { %1936 = vrot.lane.b32.xlu0 %v1652_v51, %s3634_s29 }
 0xc7a   :  { %v1650_v52 = vpop.permute.xlu1 %1649  ;;  %v1676_v12 = vpop.permute.xlu0 %1675 }
 0xc7b   :  { %1635 = vrot.lane.b32.xlu0 %v1626_v42, %s3638_s26 }
 0xc7e   :  { %v1654_v53 = vpop.permute.xlu1 %1653  ;;  %v1630_v58 = vpop.permute.xlu0 %1629 }
 0xc7f   :  { %1639 = vrot.lane.b32.xlu0 %v1626_v42, %s3639_s27 }
 0xc82   :  { %v1648_v54 = vpop.permute.xlu1 %1647  ;;  %v1632_v60 = vpop.permute.xlu0 %1631 }
 0xc83   :  { %1849 = vrot.lane.b32.xlu1 %v1648_v54, %s3634_s29 }
 0xc86   :  { %v1678_v56 = vpop.permute.xlu1 %1677 }
 0xc87   :  { %1764 = vrot.lane.b32.xlu1 %v1646_v50, %s3634_s29  ;;  %3228 = vmatprep.subr.msk.mxu1 %vm350_vm1, %v1678_v56 }
 0xc88   :  { %3229 = vmatpush3.xpose.msk.msra.mxu1 %vm350_vm1, %v1678_v56 }
 0xc89   :  { %3230 = vmatprep.subr.msk.mxu1 %vm350_vm1, %v1676_v12 }
 0xc8b   :  { %1851 = vrot.lane.b32.xlu1 %v1650_v52, %s3634_s29 }
 0xc8c   :  { %3231 = vmatpush3.xpose.msk.msra.mxu1 %vm350_vm1, %v1676_v12 }
 0xc8f   :  { %1938 = vrot.lane.b32.xlu1 %v1654_v53, %s3634_s29  ;;  %3233 = vmatmul.mubr.msk.f32.vlgmr.msra.gmra.mxu1 %vm350_vm1, %v1626_v42 }
 0xc90   :  { %3239 = vmatprep.mubr.msk.f32.mxu1 %vm350_vm1, %v1630_v58 }
 0xc93   :  { %1633 = vrot.lane.b32.xlu1 %v1625_v46, %s3638_s26 }
 0xc97   :  { %1637 = vrot.lane.b32.xlu1 %v1625_v46, %s3639_s27 }
 0xce5   :  { %v1763_v62 = vpop.permute.xlu0 %1762 }
 0xce9   :  { %v1937_v4 = vpop.permute.xlu0 %1936 }
 0xced   :  { %v1636_v1 = vpop.permute.xlu0 %1635 }
 0xcf1   :  { %v1640_v9 = vpop.permute.xlu0 %1639 }
 0xcf5   :  { %v1850_v61 = vpop.permute.xlu1 %1849 }
 0xcf9   :  { %v1765_v0 = vpop.permute.xlu1 %1764 }
 0xcfa   :  { %3235 = vmatprep.subr.msk.mxu1 %vm350_vm1, %v1765_v0 }
 0xcfb   :  { %3236 = vmatpush3.xpose.msk.msra.mxu1 %vm350_vm1, %v1765_v0 }
 0xcfc   :  { %3237 = vmatprep.subr.msk.mxu1 %vm350_vm1, %v1763_v62 }
 0xcfd   :  { %v1852_v2 = vpop.permute.xlu1 %1851 }
 0xcfe   :  { %3242 = vmatprep.subr.msk.mxu0 %vm350_vm1, %v1852_v2 }
 0xcff   :  { %3238 = vmatpush3.xpose.msk.msra.mxu1 %vm350_vm1, %v1763_v62  ;;  %3243 = vmatpush3.xpose.msk.msra.mxu0 %vm350_vm1, %v1852_v2 }
 0xd00   :  { %3244 = vmatprep.subr.msk.mxu0 %vm350_vm1, %v1850_v61 }
 0xd01   :  { %v1939_v6 = vpop.permute.xlu1 %1938 }
 0xd02   :  { %3240 = vmatmul.mubr.msk.f32.vlgmr.msra.gmra.mxu1 %vm350_vm1, %v1632_v60  ;;  %3249 = vmatprep.subr.msk.mxu1 %vm350_vm1, %v1939_v6 }
 0xd03   :  { %3245 = vmatpush3.xpose.msk.msra.mxu0 %vm350_vm1, %v1850_v61  ;;  %3250 = vmatpush3.xpose.msk.msra.mxu1 %vm350_vm1, %v1939_v6 }
 0xd04   :  { %3251 = vmatprep.subr.msk.mxu1 %vm350_vm1, %v1937_v4  ;;  %3256 = vmatprep.subr.mxu0 %v1623_v7 }
 0xd05   :  { %v1634_v8 = vpop.permute.xlu1 %1633 }
 0xd06   :  { %3246 = vmatprep.mubr.msk.f32.mxu0 %vm350_vm1, %v1634_v8 }
 0xd07   :  { %3247 = vmatmul.mubr.msk.f32.vlgmr.msra.gmra.mxu0 %vm350_vm1, %v1636_v1  ;;  %3252 = vmatpush3.xpose.msk.msra.mxu1 %vm350_vm1, %v1937_v4 }
 0xd08   :  { %3257 = vmatpush3.msra.mxu0 %v1623_v7 }
 0xd09   :  { %3258 = vmatprep.subr.mxu0 %v4115_v41  ;;  %v1638_v3 = vpop.permute.xlu1 %1637 }
 0xd0a   :  { %3259 = vmatpush3.msra.mxu0 %v4115_v41  ;;  %3253 = vmatprep.mubr.msk.f32.mxu1 %vm350_vm1, %v1638_v3 }
 0xd0b   :  { %3254 = vmatmul.mubr.msk.f32.vlgmr.msra.gmra.mxu1 %vm350_vm1, %v1640_v9 }
 0xd4f   :  { %v3234_v59 = vpop.f32.mrf.mxu1 }
 0xd50   :  { %v1759_v10 = vadd.f32 %v3234_v59, %v3869_v32 }
 0xd51   :  { %v1753_v11 = vpop.f32.mrf.mxu1 }
 0xd52   :  { %v1754_v13 = vadd.f32 %v1753_v11, %v3871_v33  ;;  %v2026_v14 = vsel %vm350_vm1, %v1759_v10, -inf }
 0xd53   :  { %2027 = vmax.xlane.f32.xlu0 %v2026_v14 }
 0xd54   :  { %v2023_v16 = vsel %vm350_vm1, %v1754_v13, -inf }
 0xd55   :  { %2024 = vmax.xlane.f32.xlu1 %v2023_v16 }
 0xdc2   :  { %v3241_v17 = vpop.f32.mrf.mxu1 }
 0xdc3   :  { %v1846_v18 = vadd.f32 %v3241_v17, %v3869_v32 }
 0xdc4   :  { %v1840_v20 = vpop.f32.mrf.mxu1 }
 0xdc5   :  { %v1841_v21 = vadd.f32 %v1840_v20, %v3871_v33  ;;  %v2032_v22 = vsel %vm350_vm1, %v1846_v18, -inf }
 0xdc6   :  { %2033 = vmax.xlane.f32.xlu0 %v2032_v22 }
 0xdc7   :  { %v3248_v23 = vpop.f32.mrf.mxu0  ;;  %v2029_v26 = vsel %vm350_vm1, %v1841_v21, -inf }
 0xdc8   :  { %v1933_v24 = vadd.f32 %v3248_v23, %v3869_v32 }
 0xdc9   :  { %v1927_v25 = vpop.f32.mrf.mxu0 }
 0xdca   :  { %v1928_v27 = vadd.f32 %v1927_v25, %v3871_v33  ;;  %2030 = vmax.xlane.f32.xlu0 %v2029_v26  ;;  %v2038_v34 = vsel %vm350_vm1, %v1933_v24, -inf }
 0xdcb   :  { %v3255_v28 = vpop.f32.mrf.mxu1 }
 0xdcc   :  { %v2035_v29 = vsel %vm350_vm1, %v1928_v27, -inf  ;;  %v2020_v30 = vadd.f32 %v3255_v28, %v3869_v32 }
 0xdcd   :  { %v2014_v31 = vpop.f32.mrf.mxu1  ;;  %2036 = vmax.xlane.f32.xlu1 %v2035_v29 }
 0xdce   :  { %v2015_v35 = vadd.f32 %v2014_v31, %v3871_v33  ;;  %2039 = vmax.xlane.f32.xlu0 %v2038_v34  ;;  %v2044_v37 = vsel %vm350_vm1, %v2020_v30, -inf }
 0xdd0   :  { %v2041_v36 = vsel %vm350_vm1, %v2015_v35, -inf }
 0xdd1   :  { %2042 = vmax.xlane.f32.xlu1 %v2041_v36 }
 0xdd2   :  { %2045 = vmax.xlane.f32.xlu0 %v2044_v37 }
 0xddc   :  { %v2028_v32 = vpop.xlane.xlu0 %2027 }
 0xddd   :  { %v2048_v38 = vsub.f32 %v1759_v10, %v2028_v32 }
 0xdde   :  { %v2025_v33 = vpop.xlane.xlu1 %2024 }
 0xddf   :  { %v2057_v39 = vmul.f32 1.442695, %v2048_v38  ;;  %v2047_v40 = vsub.f32 %v1754_v13, %v2025_v33 }
 0xde1   :  { %3478 = vpow2.f32 %v2057_v39  ;;  %v2055_v43 = vmul.f32 1.442695, %v2047_v40 }
 0xde2   :  { %1659 = vrot.lane.b32.xlu1 %v1623_v7, %s3637_s25 }
 0xde3   :  { %3480 = vpow2.f32 %v2055_v43 }
 0xde6   :  { %1665 = vrot.lane.b32.xlu1 %v1623_v7, %s3638_s26 }
 0xde8   :  { %1657 = vrot.lane.b32.xlu0 %v4115_v41, %s3637_s25 }
 0xdea   :  { %1671 = vrot.lane.b32.xlu1 %v1623_v7, %s3639_s27 }
 0xdee   :  { %v4144_v19 = vpop.eup %3478 }
 0xdef   :  { %v2074_v44 = vsel %vm350_vm1, %v4144_v19, 0.0 }
 0xdf0   :  { %v4148_v45 = vpop.eup %3480 }
 0xdf1   :  { %v2071_v46 = vsel %vm350_vm1, %v4148_v45, 0.0 }
 0xe07   :  { %2075 = vadd.xlane.f32.xlu0 %v2074_v44 }
 0xe0e   :  { %2072 = vadd.xlane.f32.xlu1 %v2071_v46  ;;  %v3418_v46 = vld [vmem:[%s4296_s6 + $0x38] sm:$0xff]  }
 0xe4f   :  { %v2034_v47 = vpop.xlane.xlu0 %2033 }
 0xe50   :  { %v2050_v48 = vsub.f32 %v1846_v18, %v2034_v47  ;;  %v3419_v47 = vld [vmem:[%s4296_s6 + $0x30] sm:$0xff]  }
 0xe52   :  { %v2061_v42 = vmul.f32 1.442695, %v2050_v48  ;;  %v3420_v48 = vld [vmem:[%s4296_s6 + $0x28] sm:$0xff]  }
 0xe53   :  { %v2031_v49 = vpop.xlane.xlu0 %2030 }
 0xe54   :  { %3482 = vpow2.f32 %v2061_v42  ;;  %v2049_v50 = vsub.f32 %v1841_v21, %v2031_v49 }
 0xe56   :  { %v2059_v51 = vmul.f32 1.442695, %v2049_v50  ;;  %v2037_v52 = vpop.xlane.xlu1 %2036  ;;  %v3421_v50 = vld [vmem:[%s4296_s6 + $0x20] sm:$0xff]  }
 0xe57   :  { %v2051_v53 = vsub.f32 %v1928_v27, %v2037_v52  ;;  %v2040_v54 = vpop.xlane.xlu0 %2039 }
 0xe58   :  { %3484 = vpow2.f32 %v2059_v51  ;;  %v2052_v56 = vsub.f32 %v1933_v24, %v2040_v54 }
 0xe59   :  { %v2063_v12 = vmul.f32 1.442695, %v2051_v53 }
 0xe5a   :  { %v2065_v58 = vmul.f32 1.442695, %v2052_v56  ;;  %v2043_v60 = vpop.xlane.xlu1 %2042 }
 0xe5b   :  { %3486 = vpow2.f32 %v2063_v12  ;;  %v2053_v61 = vsub.f32 %v2015_v35, %v2043_v60  ;;  %v2046_v62 = vpop.xlane.xlu0 %2045 }
 0xe5c   :  { %3488 = vpow2.f32 %v2065_v58  ;;  %v2054_v0 = vsub.f32 %v2020_v30, %v2046_v62 }
 0xe5d   :  { %v2067_v2 = vmul.f32 1.442695, %v2053_v61 }
 0xe5e   :  { %v2069_v4 = vmul.f32 1.442695, %v2054_v0  ;;  %v1660_v5 = vpop.permute.xlu1 %1659 }
 0xe5f   :  { %3490 = vpow2.f32 %v2067_v2  ;;  %v1658_v55 = vpop.permute.xlu0 %1657  ;;  %3263 = vmatprep.subr.mxu1 %v1660_v5 }
 0xe60   :  { %3492 = vpow2.f32 %v2069_v4  ;;  %3264 = vmatpush3.msra.mxu1 %v1660_v5 }
 0xe61   :  { %v3483_v6 = vpop.eup %3482  ;;  %3265 = vmatprep.subr.mxu1 %v1658_v55 }
 0xe62   :  { %3266 = vmatpush3.msra.mxu1 %v1658_v55  ;;  %v1666_v7 = vpop.permute.xlu1 %1665  ;;  %v2080_v1 = vsel %vm350_vm1, %v3483_v6, 0.0 }
 0xe63   :  { %2081 = vadd.xlane.f32.xlu0 %v2080_v1  ;;  %3270 = vmatprep.subr.mxu0 %v1666_v7 }
 0xe65   :  { %v3485_v8 = vpop.eup %3484 }
 0xe66   :  { %v1672_v3 = vpop.permute.xlu1 %1671  ;;  %v2077_v9 = vsel %vm350_vm1, %v3485_v8, 0.0 }
 0xe67   :  { %2078 = vadd.xlane.f32.xlu1 %v2077_v9  ;;  %3277 = vmatprep.subr.mxu1 %v1672_v3 }
 0xe68   :  { %v3487_v59 = vpop.eup %3486 }
 0xe69   :  { %v3489_v10 = vpop.eup %3488  ;;  %v2083_v11 = vsel %vm350_vm1, %v3487_v59, 0.0 }
 0xe6a   :  { %v2086_v13 = vsel %vm350_vm1, %v3489_v10, 0.0 }
 0xe6b   :  { %2087 = vadd.xlane.f32.xlu0 %v2086_v13  ;;  %2084 = vadd.xlane.f32.xlu1 %v2083_v11 }
 0xe6c   :  { %v3491_v14 = vpop.eup %3490 }
 0xe6d   :  { %v3493_v16 = vpop.eup %3492  ;;  %v2089_v17 = vsel %vm350_vm1, %v3491_v14, 0.0 }
 0xe6e   :  { %v2092_v18 = vsel %vm350_vm1, %v3493_v16, 0.0 }
 0xe6f   :  { %2093 = vadd.xlane.f32.xlu0 %v2092_v18  ;;  %2090 = vadd.xlane.f32.xlu1 %v2089_v17 }
 0xe80   :  { %1663 = vrot.lane.b32.xlu1 %v4115_v41, %s3638_s26 }
 0xe85   :  { %1669 = vrot.lane.b32.xlu0 %v4115_v41, %s3639_s27 }
 0xe90   :  { %v2076_v20 = vpop.xlane.xlu0 %2075 }
 0xe91   :  { %3494 = vrcp.f32 %v2076_v20 }
 0xe97   :  { %v2073_v21 = vpop.xlane.xlu1 %2072 }
 0xe98   :  { %3496 = vrcp.f32 %v2073_v21 }
 0xe9e   :  { %v3495_v22 = vpop.eup %3494 }
 0xe9f   :  { %v2104_v25 = vmul.f32 %v3495_v22, %v4144_v19 }
 0xea5   :  { %v3497_v23 = vpop.eup %3496 }
 0xea6   :  { %v2103_v24 = vmul.f32 %v3497_v23, %v4148_v45 }
 0xea8   :  { %3260 = vmatprep.mubr.msk.f32.mxu0 %vm350_vm1, %v2103_v24 }
 0xea9   :  { %3261 = vmatmul.mubr.msk.f32.vlgmr.msra.gmra.mxu0 %vm350_vm1, %v2104_v25 }
 0xeaa   :  { %3271 = vmatpush3.msra.mxu0 %v1666_v7 }
 0xeec   :  { %v2082_v26 = vpop.xlane.xlu0 %2081 }
 0xeed   :  { %3498 = vrcp.f32 %v2082_v26 }
 0xef0   :  { %v2079_v27 = vpop.xlane.xlu1 %2078 }
 0xef1   :  { %3500 = vrcp.f32 %v2079_v27 }
 0xef4   :  { %v2088_v41 = vpop.xlane.xlu0 %2087  ;;  %v2085_v28 = vpop.xlane.xlu1 %2084 }
 0xef5   :  { %3502 = vrcp.f32 %v2088_v41 }
 0xef6   :  { %3504 = vrcp.f32 %v2085_v28 }
 0xef8   :  { %v2094_v29 = vpop.xlane.xlu0 %2093  ;;  %v2091_v30 = vpop.xlane.xlu1 %2090 }
 0xef9   :  { %3506 = vrcp.f32 %v2094_v29 }
 0xefa   :  { %3508 = vrcp.f32 %v2091_v30  ;;  %v3499_v34 = vpop.eup %3498 }
 0xefb   :  { %v2106_v37 = vmul.f32 %v3499_v34, %v3483_v6 }
 0xefc   :  { %v1664_v31 = vpop.permute.xlu1 %1663  ;;  %v1670_v39 = vpop.permute.xlu0 %1669 }
 0xefd   :  { %3272 = vmatprep.subr.mxu0 %v1664_v31 }
 0xefe   :  { %v3501_v35 = vpop.eup %3500  ;;  %3273 = vmatpush3.msra.mxu0 %v1664_v31 }
 0xeff   :  { %v2105_v36 = vmul.f32 %v3501_v35, %v3485_v8  ;;  %3284 = vmatprep.subr.bf16.mxu0 %v3641_v15 }
 0xf01   :  { %3267 = vmatprep.mubr.msk.f32.mxu1 %vm350_vm1, %v2105_v36  ;;  %v3422_v36 = vld [vmem:[#allocation8 + $0x38] sm:$0xff]  }
 0xf02   :  { %v3503_v32 = vpop.eup %3502  ;;  %3268 = vmatmul.mubr.msk.f32.vlgmr.msra.gmra.mxu1 %vm350_vm1, %v2106_v37  ;;  %v3423_v37 = vld [vmem:[#allocation8 + $0x30] sm:$0xff]  }
 0xf03   :  { %v3505_v38 = vpop.eup %3504  ;;  %3278 = vmatpush3.msra.mxu1 %v1672_v3  ;;  %v2108_v33 = vmul.f32 %v3503_v32, %v3489_v10  ;;  %v3424_v32 = vld [vmem:[#allocation8 + $0x28] sm:$0xff]  }
 0xf04   :  { %3279 = vmatprep.subr.mxu1 %v1670_v39  ;;  %v2107_v40 = vmul.f32 %v3505_v38, %v3487_v59  ;;  %v3425_v38 = vld [vmem:[#allocation8 + $0x20] sm:$0xff]  }
 0xf05   :  { %3280 = vmatpush3.msra.mxu1 %v1670_v39  ;;  %v3426_v39 = vld [vmem:[%s4302_s12 + $0x78] sm:$0xff]  }
 0xf06   :  { %v3507_v43 = vpop.eup %3506  ;;  %3274 = vmatprep.mubr.msk.f32.mxu0 %vm350_vm1, %v2107_v40  ;;  %3296 = vmatprep.subr.bf16.mxu1 %v3641_v15  ;;  %v3428_v40 = vld [vmem:[%s4302_s12 + $0x68] sm:$0xff]  }
 0xf07   :  { %v3509_v19 = vpop.eup %3508  ;;  %3275 = vmatmul.mubr.msk.f32.vlgmr.msra.gmra.mxu0 %vm350_vm1, %v2108_v33  ;;  %v2110_v44 = vmul.f32 %v3507_v43, %v3493_v16  ;;  %v3427_v33 = vld [vmem:[%s4302_s12 + $0x70] sm:$0xff]   ;;  %v3429_v43 = vld [vmem:[%s4302_s12 + $0x60] sm:$0xff]  }
 0xf08   :  { %v2109_v45 = vmul.f32 %v3509_v19, %v3491_v14  ;;  %3292 = vmatprep.mubr.msk.bf16.mxu0 %vm3642_vm12, %v3641_v15  ;;  %3285 = vmatpush3.bf16.msra.mxu0 %v3418_v46  ;;  %v2981_v14 = vld [vmem:[%s4297_s7 + $0x1] ss:$0 sm:$0xff]  ;;  %v3430_v19 = vld [vmem:[%s4302_s12 + $0x58] sm:$0xff]  }
 0xf09   :  { %3286 = vmatprep.subr.bf16.mxu0 %v3641_v15 }
 0xf0a   :  { %3281 = vmatprep.mubr.msk.f32.mxu1 %vm350_vm1, %v2109_v45 }
 0xf0b   :  { %3282 = vmatmul.mubr.msk.f32.vlgmr.msra.gmra.mxu1 %vm350_vm1, %v2110_v44 }
 0xf0c   :  { %3304 = vmatprep.mubr.msk.bf16.mxu1 %vm3642_vm12, %v3641_v15  ;;  %3287 = vmatpush3.bf16.msra.mxu0 %v3419_v47 }
 0xf0d   :  { %3288 = vmatprep.subr.bf16.mxu0 %v3641_v15  ;;  %3297 = vmatpush3.bf16.msra.mxu1 %v3422_v36 }
 0xf0e   :  { %3298 = vmatprep.subr.bf16.mxu1 %v3641_v15 }
 0xf10   :  { %3289 = vmatpush3.bf16.msra.mxu0 %v3420_v48 }
 0xf11   :  { %3290 = vmatprep.subr.bf16.mxu0 %v3641_v15  ;;  %3299 = vmatpush3.bf16.msra.mxu1 %v3423_v37 }
 0xf12   :  { %3300 = vmatprep.subr.bf16.mxu1 %v3641_v15 }
 0xf14   :  { %3291 = vmatpush3.bf16.msra.mxu0 %v3421_v50 }
 0xf15   :  { %3308 = vmatprep.subr.bf16.mxu0 %v3641_v15  ;;  %3301 = vmatpush3.bf16.msra.mxu1 %v3424_v32 }
 0xf16   :  { %3302 = vmatprep.subr.bf16.mxu1 %v3641_v15 }
 0xf19   :  { %3303 = vmatpush3.bf16.msra.mxu1 %v3425_v38  ;;  %v3024_v38 = vld [vmem:[%s4304_s14] ss:$0 sm:$0xff] }
 0xf69   :  { %v3262_v42 = vpop.f32.mrf.mxu0 }
 0xf6b   :  { %v2183_v52 = vpop.f32.mrf.mxu0 }
 0xfc2   :  { %v3269_v49 = vpop.f32.mrf.mxu1 }
 0xfc4   :  { %v2264_v51 = vpop.f32.mrf.mxu1 }
 0xfc5   :  { %v3363_v53 = vpack.i.bf16 %v3269_v49, %v2264_v51  ;;  %v2989_v51 = vld [vmem:[%s4298_s8 + $0x1] ss:$0 sm:$0xff] }
 0xfc7   :  { %v3276_v54 = vpop.f32.mrf.mxu0  ;;  %3364 = vrot.lane.b32.xlu1 %v3363_v53, %s3631_s22 }
 0xfc9   :  { %v2345_v56 = vpop.f32.mrf.mxu0 }
 0xfca   :  { %v3368_v12 = vpack.i.bf16 %v3276_v54, %v2345_v56  ;;  %v2990_v56 = vld [vmem:[%s4299_s9 + $0x1] ss:$0 sm:$0xff] }
 0xfcb   :  { %v3283_v58 = vpop.f32.mrf.mxu1 }
 0xfcc   :  { %3369 = vrot.lane.b32.xlu0 %v3368_v12, %s3643_s21  ;;  %s3645_s21 = smov [#allocation10]  }
 0xfcd   :  { %v2426_v60 = vpop.f32.mrf.mxu1 }
 0xfce   :  { %v3373_v61 = vpack.i.bf16 %v3283_v58, %v2426_v60 }
 0xfd0   :  { %3374 = vrot.lane.b32.xlu1 %v3373_v61, %s3644_s1  ;;  %s2855_s1 = sshll.u32 %s3645_s21, 4  ;;  %s2856_s1 = int_to_ptr.vmem [resolvable:$true] %s2855_s1 }
 0xfd1   :  { %s3598_s23 = scalar_lea.vmem %s2856_s1, 256  ;;  %p3603_p7 = scmp.lt.s32.totalorder %s2856_s1, %s2856_s1 }
 0xfd2   :  { %p3599_p6 = scmp.ne.s32.totalorder %s2856_s1, %s3598_s23  ;;  %p3604_p8 = scmp.lt.s32.totalorder %s3598_s23, %s3598_s23 }
 0xfd4   :  { %p3605_p9 = por %p3604_p8, %p3603_p7 }
 0xfd6   :  { %p3606_p10 = pnand %p3605_p9, %p3599_p6 }
0x1039   :  { %v3365_v62 = vpop.permute.xlu1 %3364 }
0x103a   :  { %v3367_v2 = vunpack.i.h.bf16 %v3365_v62  ;;  %v3366_v4 = vunpack.i.l.bf16 %v3365_v62  ;;  %v3431_v62 = vld [vmem:[%s4302_s12 + $0x50] sm:$0xff]  }
0x103c   :  { %v2460_v7 = vsel %vm350_vm1, %v3262_v42, %v3367_v2  ;;  %v2459_v1 = vsel %vm350_vm1, %v2183_v52, %v3366_v4  ;;  %v3433_v2 = vld [vmem:[%s4302_s12 + $0x40] sm:$0xff]  }
0x103d   :  { %v2992_v4 = vld [vmem:[%s4301_s11 + $0x1] ss:$0 sm:$0xff] }
0x103e   :  { %v3370_v0 = vpop.permute.xlu0 %3369 }
0x103f   :  { %v3372_v5 = vunpack.i.h.bf16 %v3370_v0  ;;  %v3371_v55 = vunpack.i.l.bf16 %v3370_v0  ;;  %v3432_v0 = vld [vmem:[%s4302_s12 + $0x48] sm:$0xff]  }
0x1041   :  { %v2461_v9 = vsel %vm1133_vm13, %v2459_v1, %v3371_v55  ;;  %v2462_v59 = vsel %vm1133_vm13, %v2460_v7, %v3372_v5 }
0x1042   :  { %v3375_v6 = vpop.permute.xlu1 %3374 }
0x1043   :  { %v3377_v8 = vunpack.i.h.bf16 %v3375_v6  ;;  %v3376_v3 = vunpack.i.l.bf16 %v3375_v6 }
0x1045   :  { %v2463_v10 = vsel %vm1136_vm14, %v2461_v9, %v3376_v3  ;;  %v2464_v11 = vsel %vm1136_vm14, %v2462_v59, %v3377_v8 }
0x1046   :  { %v2465_v13 = vpack.c.bf16 %v2464_v11, %v2463_v10 }
0x1048   :  { %3293 = vmatmul.mubr.msk.bf16.vlgmr.msra.gmra.mxu0 %vm145_vm0, %v2465_v13 }
0x1049   :  { %3324 = vmatprep.mubr.msk.bf16.mxu0 %vm3642_vm12, %v3641_v15  ;;  %3309 = vmatpush3.bf16.msra.mxu0 %v3426_v39 }
0x104a   :  { %3310 = vmatprep.subr.bf16.mxu0 %v3641_v15 }
0x104d   :  { %3311 = vmatpush3.bf16.msra.mxu0 %v3427_v33  ;;  %v3025_v33 = vld [vmem:[%s4305_s15] ss:$0 sm:$0xff] }
0x104e   :  { %3312 = vmatprep.subr.bf16.mxu0 %v3641_v15 }
0x1051   :  { %3313 = vmatpush3.bf16.msra.mxu0 %v3428_v40 }
0x1052   :  { %3314 = vmatprep.subr.bf16.mxu0 %v3641_v15 }
0x1055   :  { %3315 = vmatpush3.bf16.msra.mxu0 %v3429_v43 }
0x1056   :  { %3316 = vmatprep.subr.bf16.mxu0 %v3641_v15 }
0x1059   :  { %3317 = vmatpush3.bf16.msra.mxu0 %v3430_v19 }
0x105a   :  { %3318 = vmatprep.subr.bf16.mxu0 %v3641_v15 }
0x105d   :  { %3319 = vmatpush3.bf16.msra.mxu0 %v3431_v62 }
0x105e   :  { %3320 = vmatprep.subr.bf16.mxu0 %v3641_v15 }
0x1061   :  { %3321 = vmatpush3.bf16.msra.mxu0 %v3432_v0 }
0x1062   :  { %3322 = vmatprep.subr.bf16.mxu0 %v3641_v15  ;;  %v3015_v15 = vld [vmem:[%s4303_s13 + $0x1] ss:$0 sm:$0xff] }
0x1065   :  { %3323 = vmatpush3.bf16.msra.mxu0 %v3433_v2 }
0x1108   :  { %v2544_v16 = vpop.f32.mrf.mxu0 }
0x1109   :  { %v2545_v17 = vadd.f32 %v2981_v14, %v2544_v16 }
0x110a   :  { %v3294_v18 = vpop.f32.mrf.mxu0 }
0x110b   :  { %v4210_v20 = vadd.f32 %v2545_v17, %v4025_v57 }
0x110c   :  { %v2547_v21 = vpop.f32.mrf.mxu0 }
0x110d   :  { %v2548_v22 = vadd.f32 %v2981_v14, %v2547_v21  ;;  %v2557_v23 = vsel %vm145_vm0, %v4210_v20, 0.0 }
0x110e   :  { %2558 = vadd.xlane.f32.xlu0 %v2557_v23  ;;  %v3295_v24 = vpop.f32.mrf.mxu0 }
0x110f   :  { %v4215_v25 = vadd.f32 %v2548_v22, %v4030_v63 }
0x1111   :  { %v2560_v26 = vsel %vm145_vm0, %v4215_v25, 0.0 }
0x1112   :  { %2561 = vadd.xlane.f32.xlu1 %v2560_v26 }
0x1197   :  { %v2559_v27 = vpop.xlane.xlu0 %2558 }
0x1198   :  { %v2563_v41 = vmul.f32 0.015625, %v2559_v27 }
0x119a   :  { %v2565_v28 = vsub.f32 %v4210_v20, %v2563_v41 }
0x119b   :  { %v2562_v57 = vpop.xlane.xlu1 %2561 }
0x119c   :  { %v2564_v29 = vmul.f32 0.015625, %v2562_v57  ;;  %v2567_v30 = vmul.f32 %v2565_v28, %v2565_v28 }
0x119e   :  { %v2566_v31 = vsub.f32 %v4215_v25, %v2564_v29  ;;  %v2569_v34 = vsel %vm145_vm0, %v2567_v30, 0.0 }
0x119f   :  { %2570 = vadd.xlane.f32.xlu0 %v2569_v34 }
0x11a0   :  { %v2568_v35 = vmul.f32 %v2566_v31, %v2566_v31 }
0x11a2   :  { %v2572_v63 = vsel %vm145_vm0, %v2568_v35, 0.0 }
0x11a3   :  { %2573 = vadd.xlane.f32.xlu0 %v2572_v63 }
0x1228   :  { %v2571_v44 = vpop.xlane.xlu0 %2570 }
0x1229   :  { %v2575_v45 = vmul.f32 0.015625, %v2571_v44 }
0x122b   :  { %v2577_v46 = vadd.f32 1e-05, %v2575_v45 }
0x122c   :  { %v2574_v47 = vpop.xlane.xlu0 %2573 }
0x122d   :  { %3510 = vrsqrt.f32 %v2577_v46  ;;  %v2576_v48 = vmul.f32 0.015625, %v2574_v47 }
0x122f   :  { %v2578_v42 = vadd.f32 1e-05, %v2576_v48 }
0x1231   :  { %3512 = vrsqrt.f32 %v2578_v42 }
0x123a   :  { %v3511_v49 = vpop.eup %3510 }
0x123b   :  { %v2581_v50 = vmul.f32 %v3511_v49, %v2565_v28 }
0x123d   :  { %v2589_v54 = vmul.f32 %v2989_v51, %v2581_v50 }
0x123e   :  { %v3513_v52 = vpop.eup %3512 }
0x123f   :  { %v2582_v53 = vmul.f32 %v3513_v52, %v2566_v31  ;;  %v2597_v58 = vadd.f32 %v2990_v56, %v2589_v54 }
0x1241   :  { %v2590_v12 = vmul.f32 %v2989_v51, %v2582_v53 }
0x1243   :  { %v2598_v60 = vadd.f32 %v2990_v56, %v2590_v12 }
0x1245   :  { %v2599_v61 = vpack.c.bf16 %v2598_v60, %v2597_v58 }
0x1247   :  { %3305 = vmatmul.mubr.msk.bf16.vlgmr.msra.gmra.mxu1 %vm145_vm0, %v2599_v61 }
0x1307   :  { %v2678_v5 = vpop.f32.mrf.mxu1 }
0x1308   :  { %v2679_v6 = vadd.f32 %v2992_v4, %v2678_v5 }
0x1309   :  { %v3306_v55 = vpop.f32.mrf.mxu1 }
0x130a   :  { %v2685_v3 = vmax.f32 %v2679_v6, 0.0 }
0x130b   :  { %v2681_v7 = vpop.f32.mrf.mxu1 }
0x130c   :  { %v2682_v1 = vadd.f32 %v2992_v4, %v2681_v7 }
0x130d   :  { %v3307_v8 = vpop.f32.mrf.mxu1 }
0x130e   :  { %v2686_v9 = vmax.f32 %v2682_v1, 0.0 }
0x1310   :  { %v2687_v59 = vpack.c.bf16 %v2686_v9, %v2685_v3 }
0x1312   :  { %3325 = vmatmul.mubr.bf16.vlgmr.msra.gmra.mxu0 %v2687_v59 }
0x13d2   :  { %v2795_v10 = vpop.f32.mrf.mxu0 }
0x13d3   :  { %v2796_v11 = vadd.f32 %v3015_v15, %v2795_v10 }
0x13d4   :  { %v3326_v13 = vpop.f32.mrf.mxu0 }
0x13d5   :  { %v2802_v14 = vadd.f32 %v2796_v11, %v4210_v20 }
0x13d6   :  { %v2798_v16 = vpop.f32.mrf.mxu0 }
0x13d7   :  { %v2799_v17 = vadd.f32 %v3015_v15, %v2798_v16  ;;  %v2806_v18 = vsel %vm145_vm0, %v2802_v14, 0.0 }
0x13d8   :  { %2807 = vadd.xlane.f32.xlu0 %v2806_v18  ;;  %v3327_v21 = vpop.f32.mrf.mxu0 }
0x13d9   :  { %v2803_v22 = vadd.f32 %v2799_v17, %v4215_v25 }
0x13db   :  { %v2809_v23 = vsel %vm145_vm0, %v2803_v22, 0.0 }
0x13dc   :  { %2810 = vadd.xlane.f32.xlu1 %v2809_v23 }
0x1461   :  { %v2808_v24 = vpop.xlane.xlu0 %2807 }
0x1462   :  { %v2812_v26 = vmul.f32 0.015625, %v2808_v24 }
0x1464   :  { %v2814_v27 = vsub.f32 %v2802_v14, %v2812_v26 }
0x1465   :  { %v2811_v41 = vpop.xlane.xlu1 %2810 }
0x1466   :  { %v2813_v28 = vmul.f32 0.015625, %v2811_v41  ;;  %v2816_v57 = vmul.f32 %v2814_v27, %v2814_v27 }
0x1468   :  { %v2815_v29 = vsub.f32 %v2803_v22, %v2813_v28  ;;  %v2818_v20 = vsel %vm145_vm0, %v2816_v57, 0.0 }
0x1469   :  { %2819 = vadd.xlane.f32.xlu0 %v2818_v20 }
0x146a   :  { %v2817_v30 = vmul.f32 %v2815_v29, %v2815_v29 }
0x146c   :  { %v2821_v31 = vsel %vm145_vm0, %v2817_v30, 0.0 }
0x146d   :  { %2822 = vadd.xlane.f32.xlu1 %v2821_v31 }
0x14f2   :  { %v2820_v34 = vpop.xlane.xlu0 %2819 }
0x14f3   :  { %v2824_v35 = vmul.f32 0.015625, %v2820_v34 }
0x14f5   :  { %v2826_v25 = vadd.f32 1e-05, %v2824_v35 }
0x14f6   :  { %v2823_v63 = vpop.xlane.xlu1 %2822 }
0x14f7   :  { %3514 = vrsqrt.f32 %v2826_v25  ;;  %v2825_v36 = vmul.f32 0.015625, %v2823_v63 }
0x14f9   :  { %v2827_v37 = vadd.f32 1e-05, %v2825_v36 }
0x14fb   :  { %3516 = vrsqrt.f32 %v2827_v37 }
0x1504   :  { %v3515_v32 = vpop.eup %3514 }
0x1505   :  { %v2830_v39 = vmul.f32 %v3515_v32, %v2814_v27 }
0x1507   :  { %v2838_v40 = vmul.f32 %v3024_v38, %v2830_v39 }
0x1508   :  { %v3517_v43 = vpop.eup %3516 }
0x1509   :  { %v2831_v19 = vmul.f32 %v3517_v43, %v2815_v29  ;;  %v2846_v44 = vadd.f32 %v3025_v33, %v2838_v40 }
0x150b   :  { %v2839_v45 = vmul.f32 %v3024_v38, %v2831_v19  ;;  %2848 = vst.msk [vmem:[#allocation10] sm:$0xff] %vm145_vm0, %v2846_v44 }
0x150d   :  { %v2847_v46 = vadd.f32 %v3025_v33, %v2839_v45 }
0x150f   :  { %2849 = vst.msk [vmem:[#allocation10 + $0x8] sm:$0xff] %vm145_vm0, %v2847_v46 }
0x1510   :  { %3609 = shalt.err (!%p3606_p10)
}
0x1511   :  { %s4310_s14 = smov 128  }
0x1512   :  { %2861 = dma.vmem_to_hbm [thread:$0]  %s2856_s1, 256, %s4306_s16, [#allocation4], %s4310_s14, %s4310_s14, %s3629_s0  }
0x1513   :  { %3624 = dma.done.wait [#allocation4], 256  }
0x1514   :  { %3625 = vsyncadd [#allocation4], 4294967040 }
0x1515   :  { %2865 = vsyncpa [#allocation3], 1 }
0x1516   :  { %2866 = vsyncpa [#allocation6], 1 }
0x1517   :  { %2867 = vsyncpa [#allocation9], 1 }
0x1518   :  { %2868 = vsyncpa [#allocation4], 1 }

</bundles_post_ra>
